<compile_context>
chip_gen: v5e
topology: v5e:2x2
jax: 0.10.0
libtpu: 0.0.40
codegen_flags: <defaults>
</compile_context>

<pallas_src>
import functools

import jax
import jax.numpy as jnp
from jax.experimental import pallas as pl
from jax.experimental.pallas import tpu as pltpu


VMEM_SPEC = pl.BlockSpec(memory_space=pltpu.MemorySpace.VMEM)
_LN_EPS = 1e-5
_LEAKY_SLOPE = 0.01

INPUT_KEYS = ["f0_scaled", "loudness_scaled"]
OUTPUT_KEYS = ["amplitude", "harmonic_distribution", "noise_bands"]


# ----------------------------------------------------------------------------
# Fused decoder kernel
# ----------------------------------------------------------------------------
# vec slab row layout (width 3H, params left-justified, static offsets):
#   0..9   : in_mlp0  w1, b1, g1, be1, b2, g2, be2, b3, g3, be3
#   10..19 : in_mlp1  (same order)
#   20..30 : out_mlp  w1_f0row, w1_loudrow, b1, g1, be1, b2, g2, be2, b3, g3, be3
#   31     : gi bias  = b_ih + [b_hr | b_hz | 0]          (width 3H)
#   32     : b_hn                                          (width H)
#
# wh slab row layout (width H):
#   [0:H]  in_mlp0.w2  [H:2H]  in_mlp0.w3  [2H:3H] in_mlp1.w2  [3H:4H] in_mlp1.w3
#   [4H:5H] out_mlp.w1[0:H]   [5H:6H] out_mlp.w2   [6H:7H] out_mlp.w3
#
# w3h slab row layout (width 3H, gate columns r|z|n):
#   [0:H] wih (in_mlp0 block)   [H:2H] wih (in_mlp1 block)   [2H:3H] whh
#
# wp slab: rows [0:H] fused proj weights (zero-padded to 256 lanes), row H bias.
def _decoder_kernel(x_ref, wh_ref, w3h_ref, vec_ref, wp_ref, out_ref,
                    *, batch, tsteps, hidden):
    H = hidden

    def vrow(r, w=H):
        return vec_ref[r:r + 1, 0:w]                     # static slice -> [1, w]

    def ln_leaky(h, gbase):
        """LayerNorm (biased var, eps inside rsqrt) + LeakyReLU(0.01)."""
        g, be = vrow(gbase), vrow(gbase + 1)
        mu = jnp.mean(h, axis=-1, keepdims=True)
        var = jnp.mean((h - mu) ** 2, axis=-1, keepdims=True)
        h = (h - mu) * jax.lax.rsqrt(var + _LN_EPS)
        h = h * g + be
        return jnp.where(h >= 0.0, h, _LEAKY_SLOPE * h)

    f0 = x_ref[:, 0:1]                                   # [N, 1] (time-major rows)
    loud = x_ref[:, 1:2]

    # ---- per-frame input MLPs, batched over all T*B frames -----------------
    def in_mlp(xcol, vbase, wbase):
        # layer 1: Din == 1 -> pure VPU broadcast multiply, no MXU
        h = xcol * vrow(vbase) + vrow(vbase + 1)
        h = ln_leaky(h, vbase + 2)
        h = jnp.dot(h, wh_ref[wbase:wbase + H, :],
                    preferred_element_type=jnp.float32) + vrow(vbase + 4)
        h = ln_leaky(h, vbase + 5)
        h = jnp.dot(h, wh_ref[wbase + H:wbase + 2 * H, :],
                    preferred_element_type=jnp.float32) + vrow(vbase + 7)
        h = ln_leaky(h, vbase + 8)
        return h

    m0 = in_mlp(f0, 0, 0)                                # [N, H]
    m1 = in_mlp(loud, 10, 2 * H)                         # [N, H]

    # ---- GRU ----------------------------------------------------------------
    wih_a = w3h_ref[0:H, :]                              # [H, 3H]
    wih_b = w3h_ref[H:2 * H, :]                          # [H, 3H]
    whh = w3h_ref[2 * H:3 * H, :]                        # [H, 3H]

    # Hoisted input projection (2 fused matmuls); b_ih and b_hr/b_hz folded in.
    gi = (jnp.dot(m0, wih_a, preferred_element_type=jnp.float32)
          + jnp.dot(m1, wih_b, preferred_element_type=jnp.float32)
          + vrow(31, 3 * H))                             # [N, 3H]
    # b_hn stays inside r * (.) (PyTorch semantics); broadcast once, outside loop.
    bhh_n = jnp.broadcast_to(vrow(32), (batch, H))

    h = jnp.zeros((batch, H), jnp.float32)
    hs = []
    for t in range(tsteps):                              # static -> fully unrolled
        lo = t * batch
        gi_t = gi[lo:lo + batch, :]
        gh = jnp.dot(h, whh, preferred_element_type=jnp.float32)   # one MXU push
        r = jax.nn.sigmoid(gi_t[:, 0:H] + gh[:, 0:H])
        z = jax.nn.sigmoid(gi_t[:, H:2 * H] + gh[:, H:2 * H])
        n = jnp.tanh(gi_t[:, 2 * H:3 * H] + r * (gh[:, 2 * H:3 * H] + bhh_n))
        h = (1.0 - z) * n + z * h
        hs.append(h)
    g_all = jnp.concatenate(hs, axis=0)                  # [N, H], stays in vregs

    # ---- output MLP: first layer decomposed (no [N, H+2] concat) ------------
    h1 = (jnp.dot(g_all, wh_ref[4 * H:5 * H, :],
                  preferred_element_type=jnp.float32)
          + f0 * vrow(20) + loud * vrow(21) + vrow(22))
    h1 = ln_leaky(h1, 23)
    h2 = jnp.dot(h1, wh_ref[5 * H:6 * H, :],
                 preferred_element_type=jnp.float32) + vrow(25)
    h2 = ln_leaky(h2, 26)
    h3 = jnp.dot(h2, wh_ref[6 * H:7 * H, :],
                 preferred_element_type=jnp.float32) + vrow(28)
    h3 = ln_leaky(h3, 29)

    # ---- fused, zero-padded, lane-dense output projection --------------------
    out_ref[...] = (jnp.dot(h3, wp_ref[0:H, :], preferred_element_type=jnp.float32)
                    + wp_ref[H:H + 1, :])


# ----------------------------------------------------------------------------
# One-time parameter packing: canonical params -> 4 VMEM slabs
# ----------------------------------------------------------------------------
def pack_decoder_params(params, hidden_size):
    """Pack all parameters into a handful of slabs.  Call ONCE per parameter
    set (not per forward call) and reuse the result."""
    H = hidden_size
    W3 = 3 * H
    f32 = jnp.float32

    def row(x, width):
        r = jnp.zeros((1, width), f32)
        return r.at[:, :x.shape[-1]].set(x.reshape(1, -1).astype(f32))

    # ---- vec slab (all [1, *] parameters stacked along rows) ----
    rows = []
    for mlp in params["in_mlps"]:
        (w1, b1, g1, be1), (w2, b2, g2, be2), (w3, b3, g3, be3) = mlp
        rows += [row(w1, W3), row(b1, W3), row(g1, W3), row(be1, W3),
                 row(b2, W3), row(g2, W3), row(be2, W3),
                 row(b3, W3), row(g3, W3), row(be3, W3)]
    (ow1, ob1, og1, obe1), (ow2, ob2, og2, obe2), (ow3, ob3, og3, obe3) = \
        params["out_mlp"]
    rows += [row(ow1[H:H + 1, :], W3), row(ow1[H + 1:H + 2, :], W3),
             row(ob1, W3), row(og1, W3), row(obe1, W3),
             row(ob2, W3), row(og2, W3), row(obe2, W3),
             row(ob3, W3), row(og3, W3), row(obe3, W3)]
    wih, whh, bih, bhh = params["gru"]                   # gate columns r|z|n
    gi_bias = bih + jnp.concatenate(
        [bhh[:, 0:2 * H], jnp.zeros((1, H), f32)], axis=-1)
    rows += [row(gi_bias, W3), row(bhh[:, 2 * H:3 * H], W3)]
    vec_slab = jnp.concatenate(rows, axis=0)             # [33, 3H]

    # ---- weight slab (all *->H weight matrices, H-aligned rows) ----
    wh_slab = jnp.concatenate([
        params["in_mlps"][0][1][0], params["in_mlps"][0][2][0],
        params["in_mlps"][1][1][0], params["in_mlps"][1][2][0],
        ow1[0:H, :], ow2, ow3], axis=0).astype(f32)      # [7H, H]

    # ---- GRU slab ----
    w3h_slab = jnp.concatenate([wih, whh], axis=0).astype(f32)   # [3H, 3H]

    # ---- fused output projection slab (zero-padded, lane-dense) ----
    sizes = tuple(w.shape[1] for (w, _) in params["proj"])
    total = sum(sizes)
    padded = max(128, ((total + 127) // 128) * 128)
    wp = jnp.zeros((H + 1, padded), f32)
    off = 0
    for (w, b) in params["proj"]:
        wp = wp.at[0:H, off:off + w.shape[1]].set(w)
        wp = wp.at[H:H + 1, off:off + w.shape[1]].set(b)
        off += w.shape[1]

    return {"vec": vec_slab, "wh": wh_slab, "w3h": w3h_slab, "wp": wp,
            "sizes": sizes, "padded": padded, "hidden": H}


# ----------------------------------------------------------------------------
# Forward: single pallas_call over the packed slabs
# ----------------------------------------------------------------------------
def rnn_fc_decoder_forward(x, packed):
    H = packed["hidden"]
    B, T, _ = x[INPUT_KEYS[0]].shape
    N = B * T

    # Time-major flatten (row = t*B + b), merged into one [N, 2] input column.
    xin = jnp.concatenate([x["f0_scaled"], x["loudness_scaled"]], axis=-1)
    xin = xin.transpose(1, 0, 2).reshape(N, 2).astype(jnp.float32)

    out2d = pl.pallas_call(
        functools.partial(_decoder_kernel, batch=B, tsteps=T, hidden=H),
        out_shape=jax.ShapeDtypeStruct((N, packed["padded"]), jnp.float32),
        in_specs=[VMEM_SPEC] * 5,
        out_specs=VMEM_SPEC,
    )(xin, packed["wh"], packed["w3h"], packed["vec"], packed["wp"])

    out_bt = out2d.reshape(T, B, packed["padded"]).transpose(1, 0, 2)  # [B,T,pad]
    controls = {}
    off = 0
    for k, s in zip(OUTPUT_KEYS, packed["sizes"]):
        controls[k] = out_bt[:, :, off:off + s]
        off += s
    controls["f0_hz"] = x["f0"]
    return controls


# ----------------------------------------------------------------------------
# Parameter construction (deterministic, synthetic) — canonical layout
# ----------------------------------------------------------------------------
def _make_mlp_params(key, in_size, hidden, n_layers=3):
    sizes = [in_size] + [hidden] * n_layers
    layers = []
    for i in range(n_layers):
        key, k1, k2, k3, k4 = jax.random.split(key, 5)
        w = 0.1 * jax.random.normal(k1, (sizes[i], sizes[i + 1]), jnp.float32)
        b = 0.05 * jax.random.normal(k2, (1, sizes[i + 1]), jnp.float32)
        g = 1.0 + 0.05 * jax.random.normal(k3, (1, sizes[i + 1]), jnp.float32)
        be = 0.05 * jax.random.normal(k4, (1, sizes[i + 1]), jnp.float32)
        layers.append((w, b, g, be))
    return layers, key


def _make_gru_params(key, in_size, hidden):
    key, k1, k2, k3, k4 = jax.random.split(key, 5)
    wih = 0.1 * jax.random.normal(k1, (in_size, 3 * hidden), jnp.float32)
    whh = 0.1 * jax.random.normal(k2, (hidden, 3 * hidden), jnp.float32)
    bih = 0.05 * jax.random.normal(k3, (1, 3 * hidden), jnp.float32)
    bhh = 0.05 * jax.random.normal(k4, (1, 3 * hidden), jnp.float32)
    return (wih, whh, bih, bhh), key


def _make_linear_params(key, in_size, out_size):
    key, k1, k2 = jax.random.split(key, 3)
    w = 0.1 * jax.random.normal(k1, (in_size, out_size), jnp.float32)
    b = 0.05 * jax.random.normal(k2, (1, out_size), jnp.float32)
    return (w, b), key


def make_decoder_params(key, hidden_size, input_sizes, output_sizes):
    params = {}
    in_mlps = []
    for s in input_sizes:
        layers, key = _make_mlp_params(key, s, hidden_size)
        in_mlps.append(layers)
    params["in_mlps"] = in_mlps
    params["gru"], key = _make_gru_params(key, len(input_sizes) * hidden_size,
                                          hidden_size)
    params["out_mlp"], key = _make_mlp_params(key, hidden_size + 2, hidden_size)
    projs = []
    for s in output_sizes:
        p, key = _make_linear_params(key, hidden_size, s)
        projs.append(p)
    params["proj"] = projs
    return params


# ----------------------------------------------------------------------------
# Pure-JAX reference (same math, canonical params)
# ----------------------------------------------------------------------------
def _ref_mlp3(x, layers):
    h = x
    for w, bb, g, be in layers:
        h = h @ w + bb
        mu = h.mean(-1, keepdims=True)
        var = ((h - mu) ** 2).mean(-1, keepdims=True)
        h = (h - mu) / jnp.sqrt(var + _LN_EPS)
        h = h * g + be
        h = jnp.where(h >= 0.0, h, _LEAKY_SLOPE * h)
    return h


def _ref_gru(x_tb, wih, whh, bih, bhh):
    hdim = whh.shape[0]
    bsz = x_tb.shape[1]

    def step(h, x_t):
        gi = x_t @ wih + bih
        gh = h @ whh + bhh
        r = jax.nn.sigmoid(gi[:, :hdim] + gh[:, :hdim])
        z = jax.nn.sigmoid(gi[:, hdim:2 * hdim] + gh[:, hdim:2 * hdim])
        n = jnp.tanh(gi[:, 2 * hdim:] + r * gh[:, 2 * hdim:])
        h_new = (1.0 - z) * n + z * h
        return h_new, h_new

    h0 = jnp.zeros((bsz, hdim), jnp.float32)
    _, ys = jax.lax.scan(step, h0, x_tb)
    return ys


def rnn_fc_decoder_reference(x, params):
    b, t, _ = x[INPUT_KEYS[0]].shape
    feats = [_ref_mlp3(x[k].reshape(b * t, -1), params["in_mlps"][v])
             for v, k in enumerate(INPUT_KEYS)]
    hidden = jnp.concatenate(feats, axis=-1)
    hdim = params["gru"][1].shape[0]
    h_tb = hidden.reshape(b, t, -1).transpose(1, 0, 2)
    g_tb = _ref_gru(h_tb, *params["gru"])
    g_bt = g_tb.transpose(1, 0, 2).reshape(b * t, hdim)
    cat = jnp.concatenate(
        [g_bt, x["f0_scaled"].reshape(b * t, -1),
         x["loudness_scaled"].reshape(b * t, -1)], axis=-1)
    out_h = _ref_mlp3(cat, params["out_mlp"])
    controls = {}
    for v, k in enumerate(OUTPUT_KEYS):
        w, bias = params["proj"][v]
        controls[k] = (out_h @ w + bias).reshape(b, t, -1)
    controls["f0_hz"] = x["f0"]
    return controls


# ----------------------------------------------------------------------------
if __name__ == "__main__":
    HIDDEN = 32
    INPUT_SIZES = [1, 1]
    OUTPUT_SIZES = [1, 100, 65]
    B, T = 2, 8

    key = jax.random.PRNGKey(0)
    key, kf, kl, kh = jax.random.split(key, 4)
    x = {
        "f0_scaled": jax.random.uniform(kf, (B, T, 1), jnp.float32),
        "loudness_scaled": jax.random.uniform(kl, (B, T, 1), jnp.float32),
        "f0": 100.0 + 300.0 * jax.random.uniform(kh, (B, T, 1), jnp.float32),
    }
    params = make_decoder_params(key, HIDDEN, INPUT_SIZES, OUTPUT_SIZES)

    # One-time parameter packing (hoisted out of the per-call path).
    packed = jax.block_until_ready(
        jax.tree_util.tree_map(lambda a: a, pack_decoder_params(params, HIDDEN)))

    controls = rnn_fc_decoder_forward(x, packed)
    controls = jax.block_until_ready(controls)

    # sanity check against a pure-JAX reference of the same math
    ref = rnn_fc_decoder_reference(x, params)
    for k in OUTPUT_KEYS + ["f0_hz"]:
        assert controls[k].shape == ref[k].shape, (k, controls[k].shape, ref[k].shape)
        assert jnp.allclose(controls[k], ref[k], atol=1e-4, rtol=1e-4), k

    print("KERNEL_OK")
</pallas_src>

<mosaic_0001>
module attributes {stable_mosaic.version = 11 : i64} {
  func.func @_decoder_kernel(%arg0: memref<16x2xf32, #tpu.memory_space<vmem>>, %arg1: memref<224x32xf32, #tpu.memory_space<vmem>>, %arg2: memref<96x96xf32, #tpu.memory_space<vmem>>, %arg3: memref<33x96xf32, #tpu.memory_space<vmem>>, %arg4: memref<33x256xf32, #tpu.memory_space<vmem>>, %arg5: memref<16x256xf32, #tpu.memory_space<vmem>>) attributes {dimension_semantics = [], scalar_prefetch = 0 : i64, scratch_operands = 0 : i64, tpu.core_type = #tpu.core_type<tc>} {
    %c0 = arith.constant 0 : index
    %c0_0 = arith.constant 0 : index
    %0 = vector.load %arg0[%c0, %c0_0] : memref<16x2xf32, #tpu.memory_space<vmem>>, vector<16x1xf32>
    %c0_1 = arith.constant 0 : index
    %c1 = arith.constant 1 : index
    %1 = vector.load %arg0[%c0_1, %c1] : memref<16x2xf32, #tpu.memory_space<vmem>>, vector<16x1xf32>
    %c0_2 = arith.constant 0 : index
    %c0_3 = arith.constant 0 : index
    %2 = vector.load %arg3[%c0_2, %c0_3] : memref<33x96xf32, #tpu.memory_space<vmem>>, vector<1x32xf32>
    %3 = vector.broadcast %0 : vector<16x1xf32> to vector<16x32xf32>
    %4 = vector.broadcast %2 : vector<1x32xf32> to vector<16x32xf32>
    %5 = arith.mulf %3, %4 : vector<16x32xf32>
    %c1_4 = arith.constant 1 : index
    %c0_5 = arith.constant 0 : index
    %6 = vector.load %arg3[%c1_4, %c0_5] : memref<33x96xf32, #tpu.memory_space<vmem>>, vector<1x32xf32>
    %7 = vector.broadcast %6 : vector<1x32xf32> to vector<16x32xf32>
    %8 = arith.addf %5, %7 : vector<16x32xf32>
    %c2 = arith.constant 2 : index
    %c0_6 = arith.constant 0 : index
    %9 = vector.load %arg3[%c2, %c0_6] : memref<33x96xf32, #tpu.memory_space<vmem>>, vector<1x32xf32>
    %c3 = arith.constant 3 : index
    %c0_7 = arith.constant 0 : index
    %10 = vector.load %arg3[%c3, %c0_7] : memref<33x96xf32, #tpu.memory_space<vmem>>, vector<1x32xf32>
    %cst = arith.constant dense<0.000000e+00> : vector<16xf32>
    %11 = vector.multi_reduction <add>, %8, %cst [1] : vector<16x32xf32> to vector<16xf32>
    %12 = vector.shape_cast %11 : vector<16xf32> to vector<16x1xf32>
    %cst_8 = arith.constant 3.200000e+01 : f32
    %13 = vector.broadcast %cst_8 : f32 to vector<16x1xf32>
    %14 = arith.divf %12, %13 : vector<16x1xf32>
    %15 = vector.broadcast %14 : vector<16x1xf32> to vector<16x32xf32>
    %16 = arith.subf %8, %15 : vector<16x32xf32>
    %17 = arith.mulf %16, %16 : vector<16x32xf32>
    %cst_9 = arith.constant dense<0.000000e+00> : vector<16xf32>
    %18 = vector.multi_reduction <add>, %17, %cst_9 [1] : vector<16x32xf32> to vector<16xf32>
    %19 = vector.shape_cast %18 : vector<16xf32> to vector<16x1xf32>
    %cst_10 = arith.constant 3.200000e+01 : f32
    %20 = vector.broadcast %cst_10 : f32 to vector<16x1xf32>
    %21 = arith.divf %19, %20 : vector<16x1xf32>
    %22 = vector.broadcast %14 : vector<16x1xf32> to vector<16x32xf32>
    %23 = arith.subf %8, %22 : vector<16x32xf32>
    %cst_11 = arith.constant 9.99999974E-6 : f32
    %24 = vector.broadcast %cst_11 : f32 to vector<16x1xf32>
    %25 = arith.addf %21, %24 : vector<16x1xf32>
    %26 = math.rsqrt %25 : vector<16x1xf32>
    %27 = vector.broadcast %26 : vector<16x1xf32> to vector<16x32xf32>
    %28 = arith.mulf %23, %27 : vector<16x32xf32>
    %29 = vector.broadcast %9 : vector<1x32xf32> to vector<16x32xf32>
    %30 = arith.mulf %28, %29 : vector<16x32xf32>
    %31 = vector.broadcast %10 : vector<1x32xf32> to vector<16x32xf32>
    %32 = arith.addf %30, %31 : vector<16x32xf32>
    %cst_12 = arith.constant 0.000000e+00 : f32
    %33 = vector.broadcast %cst_12 : f32 to vector<16x32xf32>
    %34 = arith.cmpf oge, %32, %33 : vector<16x32xf32>
    %cst_13 = arith.constant 0.00999999977 : f32
    %35 = vector.broadcast %cst_13 : f32 to vector<16x32xf32>
    %36 = arith.mulf %35, %32 : vector<16x32xf32>
    %37 = arith.select %34, %32, %36 : vector<16x32xi1>, vector<16x32xf32>
    %c0_14 = arith.constant 0 : index
    %c0_15 = arith.constant 0 : index
    %38 = vector.load %arg1[%c0_14, %c0_15] : memref<224x32xf32, #tpu.memory_space<vmem>>, vector<32x32xf32>
    %cst_16 = arith.constant dense<0.000000e+00> : vector<16x32xf32>
    %39 = tpu.matmul %37, %38, %cst_16 {dimension_numbers = #tpu.dot_dimension_numbers<[1], [0], [0], [1], [0, 0, 1, 1], [], []>} : vector<16x32xf32>, vector<32x32xf32>, vector<16x32xf32> -> vector<16x32xf32>
    %c4 = arith.constant 4 : index
    %c0_17 = arith.constant 0 : index
    %40 = vector.load %arg3[%c4, %c0_17] : memref<33x96xf32, #tpu.memory_space<vmem>>, vector<1x32xf32>
    %41 = vector.broadcast %40 : vector<1x32xf32> to vector<16x32xf32>
    %42 = arith.addf %39, %41 : vector<16x32xf32>
    %c5 = arith.constant 5 : index
    %c0_18 = arith.constant 0 : index
    %43 = vector.load %arg3[%c5, %c0_18] : memref<33x96xf32, #tpu.memory_space<vmem>>, vector<1x32xf32>
    %c6 = arith.constant 6 : index
    %c0_19 = arith.constant 0 : index
    %44 = vector.load %arg3[%c6, %c0_19] : memref<33x96xf32, #tpu.memory_space<vmem>>, vector<1x32xf32>
    %cst_20 = arith.constant dense<0.000000e+00> : vector<16xf32>
    %45 = vector.multi_reduction <add>, %42, %cst_20 [1] : vector<16x32xf32> to vector<16xf32>
    %46 = vector.shape_cast %45 : vector<16xf32> to vector<16x1xf32>
    %cst_21 = arith.constant 3.200000e+01 : f32
    %47 = vector.broadcast %cst_21 : f32 to vector<16x1xf32>
    %48 = arith.divf %46, %47 : vector<16x1xf32>
    %49 = vector.broadcast %48 : vector<16x1xf32> to vector<16x32xf32>
    %50 = arith.subf %42, %49 : vector<16x32xf32>
    %51 = arith.mulf %50, %50 : vector<16x32xf32>
    %cst_22 = arith.constant dense<0.000000e+00> : vector<16xf32>
    %52 = vector.multi_reduction <add>, %51, %cst_22 [1] : vector<16x32xf32> to vector<16xf32>
    %53 = vector.shape_cast %52 : vector<16xf32> to vector<16x1xf32>
    %cst_23 = arith.constant 3.200000e+01 : f32
    %54 = vector.broadcast %cst_23 : f32 to vector<16x1xf32>
    %55 = arith.divf %53, %54 : vector<16x1xf32>
    %56 = vector.broadcast %48 : vector<16x1xf32> to vector<16x32xf32>
    %57 = arith.subf %42, %56 : vector<16x32xf32>
    %cst_24 = arith.constant 9.99999974E-6 : f32
    %58 = vector.broadcast %cst_24 : f32 to vector<16x1xf32>
    %59 = arith.addf %55, %58 : vector<16x1xf32>
    %60 = math.rsqrt %59 : vector<16x1xf32>
    %61 = vector.broadcast %60 : vector<16x1xf32> to vector<16x32xf32>
    %62 = arith.mulf %57, %61 : vector<16x32xf32>
    %63 = vector.broadcast %43 : vector<1x32xf32> to vector<16x32xf32>
    %64 = arith.mulf %62, %63 : vector<16x32xf32>
    %65 = vector.broadcast %44 : vector<1x32xf32> to vector<16x32xf32>
    %66 = arith.addf %64, %65 : vector<16x32xf32>
    %cst_25 = arith.constant 0.000000e+00 : f32
    %67 = vector.broadcast %cst_25 : f32 to vector<16x32xf32>
    %68 = arith.cmpf oge, %66, %67 : vector<16x32xf32>
    %cst_26 = arith.constant 0.00999999977 : f32
    %69 = vector.broadcast %cst_26 : f32 to vector<16x32xf32>
    %70 = arith.mulf %69, %66 : vector<16x32xf32>
    %71 = arith.select %68, %66, %70 : vector<16x32xi1>, vector<16x32xf32>
    %c32 = arith.constant 32 : index
    %c0_27 = arith.constant 0 : index
    %72 = vector.load %arg1[%c32, %c0_27] : memref<224x32xf32, #tpu.memory_space<vmem>>, vector<32x32xf32>
    %cst_28 = arith.constant dense<0.000000e+00> : vector<16x32xf32>
    %73 = tpu.matmul %71, %72, %cst_28 {dimension_numbers = #tpu.dot_dimension_numbers<[1], [0], [0], [1], [0, 0, 1, 1], [], []>} : vector<16x32xf32>, vector<32x32xf32>, vector<16x32xf32> -> vector<16x32xf32>
    %c7 = arith.constant 7 : index
    %c0_29 = arith.constant 0 : index
    %74 = vector.load %arg3[%c7, %c0_29] : memref<33x96xf32, #tpu.memory_space<vmem>>, vector<1x32xf32>
    %75 = vector.broadcast %74 : vector<1x32xf32> to vector<16x32xf32>
    %76 = arith.addf %73, %75 : vector<16x32xf32>
    %c8 = arith.constant 8 : index
    %c0_30 = arith.constant 0 : index
    %77 = vector.load %arg3[%c8, %c0_30] : memref<33x96xf32, #tpu.memory_space<vmem>>, vector<1x32xf32>
    %c9 = arith.constant 9 : index
    %c0_31 = arith.constant 0 : index
    %78 = vector.load %arg3[%c9, %c0_31] : memref<33x96xf32, #tpu.memory_space<vmem>>, vector<1x32xf32>
    %cst_32 = arith.constant dense<0.000000e+00> : vector<16xf32>
    %79 = vector.multi_reduction <add>, %76, %cst_32 [1] : vector<16x32xf32> to vector<16xf32>
    %80 = vector.shape_cast %79 : vector<16xf32> to vector<16x1xf32>
    %cst_33 = arith.constant 3.200000e+01 : f32
    %81 = vector.broadcast %cst_33 : f32 to vector<16x1xf32>
    %82 = arith.divf %80, %81 : vector<16x1xf32>
    %83 = vector.broadcast %82 : vector<16x1xf32> to vector<16x32xf32>
    %84 = arith.subf %76, %83 : vector<16x32xf32>
    %85 = arith.mulf %84, %84 : vector<16x32xf32>
    %cst_34 = arith.constant dense<0.000000e+00> : vector<16xf32>
    %86 = vector.multi_reduction <add>, %85, %cst_34 [1] : vector<16x32xf32> to vector<16xf32>
    %87 = vector.shape_cast %86 : vector<16xf32> to vector<16x1xf32>
    %cst_35 = arith.constant 3.200000e+01 : f32
    %88 = vector.broadcast %cst_35 : f32 to vector<16x1xf32>
    %89 = arith.divf %87, %88 : vector<16x1xf32>
    %90 = vector.broadcast %82 : vector<16x1xf32> to vector<16x32xf32>
    %91 = arith.subf %76, %90 : vector<16x32xf32>
    %cst_36 = arith.constant 9.99999974E-6 : f32
    %92 = vector.broadcast %cst_36 : f32 to vector<16x1xf32>
    %93 = arith.addf %89, %92 : vector<16x1xf32>
    %94 = math.rsqrt %93 : vector<16x1xf32>
    %95 = vector.broadcast %94 : vector<16x1xf32> to vector<16x32xf32>
    %96 = arith.mulf %91, %95 : vector<16x32xf32>
    %97 = vector.broadcast %77 : vector<1x32xf32> to vector<16x32xf32>
    %98 = arith.mulf %96, %97 : vector<16x32xf32>
    %99 = vector.broadcast %78 : vector<1x32xf32> to vector<16x32xf32>
    %100 = arith.addf %98, %99 : vector<16x32xf32>
    %cst_37 = arith.constant 0.000000e+00 : f32
    %101 = vector.broadcast %cst_37 : f32 to vector<16x32xf32>
    %102 = arith.cmpf oge, %100, %101 : vector<16x32xf32>
    %cst_38 = arith.constant 0.00999999977 : f32
    %103 = vector.broadcast %cst_38 : f32 to vector<16x32xf32>
    %104 = arith.mulf %103, %100 : vector<16x32xf32>
    %105 = arith.select %102, %100, %104 : vector<16x32xi1>, vector<16x32xf32>
    %c10 = arith.constant 10 : index
    %c0_39 = arith.constant 0 : index
    %106 = vector.load %arg3[%c10, %c0_39] : memref<33x96xf32, #tpu.memory_space<vmem>>, vector<1x32xf32>
    %107 = vector.broadcast %1 : vector<16x1xf32> to vector<16x32xf32>
    %108 = vector.broadcast %106 : vector<1x32xf32> to vector<16x32xf32>
    %109 = arith.mulf %107, %108 : vector<16x32xf32>
    %c11 = arith.constant 11 : index
    %c0_40 = arith.constant 0 : index
    %110 = vector.load %arg3[%c11, %c0_40] : memref<33x96xf32, #tpu.memory_space<vmem>>, vector<1x32xf32>
    %111 = vector.broadcast %110 : vector<1x32xf32> to vector<16x32xf32>
    %112 = arith.addf %109, %111 : vector<16x32xf32>
    %c12 = arith.constant 12 : index
    %c0_41 = arith.constant 0 : index
    %113 = vector.load %arg3[%c12, %c0_41] : memref<33x96xf32, #tpu.memory_space<vmem>>, vector<1x32xf32>
    %c13 = arith.constant 13 : index
    %c0_42 = arith.constant 0 : index
    %114 = vector.load %arg3[%c13, %c0_42] : memref<33x96xf32, #tpu.memory_space<vmem>>, vector<1x32xf32>
    %cst_43 = arith.constant dense<0.000000e+00> : vector<16xf32>
    %115 = vector.multi_reduction <add>, %112, %cst_43 [1] : vector<16x32xf32> to vector<16xf32>
    %116 = vector.shape_cast %115 : vector<16xf32> to vector<16x1xf32>
    %cst_44 = arith.constant 3.200000e+01 : f32
    %117 = vector.broadcast %cst_44 : f32 to vector<16x1xf32>
    %118 = arith.divf %116, %117 : vector<16x1xf32>
    %119 = vector.broadcast %118 : vector<16x1xf32> to vector<16x32xf32>
    %120 = arith.subf %112, %119 : vector<16x32xf32>
    %121 = arith.mulf %120, %120 : vector<16x32xf32>
    %cst_45 = arith.constant dense<0.000000e+00> : vector<16xf32>
    %122 = vector.multi_reduction <add>, %121, %cst_45 [1] : vector<16x32xf32> to vector<16xf32>
    %123 = vector.shape_cast %122 : vector<16xf32> to vector<16x1xf32>
    %cst_46 = arith.constant 3.200000e+01 : f32
    %124 = vector.broadcast %cst_46 : f32 to vector<16x1xf32>
    %125 = arith.divf %123, %124 : vector<16x1xf32>
    %126 = vector.broadcast %118 : vector<16x1xf32> to vector<16x32xf32>
    %127 = arith.subf %112, %126 : vector<16x32xf32>
    %cst_47 = arith.constant 9.99999974E-6 : f32
    %128 = vector.broadcast %cst_47 : f32 to vector<16x1xf32>
    %129 = arith.addf %125, %128 : vector<16x1xf32>
    %130 = math.rsqrt %129 : vector<16x1xf32>
    %131 = vector.broadcast %130 : vector<16x1xf32> to vector<16x32xf32>
    %132 = arith.mulf %127, %131 : vector<16x32xf32>
    %133 = vector.broadcast %113 : vector<1x32xf32> to vector<16x32xf32>
    %134 = arith.mulf %132, %133 : vector<16x32xf32>
    %135 = vector.broadcast %114 : vector<1x32xf32> to vector<16x32xf32>
    %136 = arith.addf %134, %135 : vector<16x32xf32>
    %cst_48 = arith.constant 0.000000e+00 : f32
    %137 = vector.broadcast %cst_48 : f32 to vector<16x32xf32>
    %138 = arith.cmpf oge, %136, %137 : vector<16x32xf32>
    %cst_49 = arith.constant 0.00999999977 : f32
    %139 = vector.broadcast %cst_49 : f32 to vector<16x32xf32>
    %140 = arith.mulf %139, %136 : vector<16x32xf32>
    %141 = arith.select %138, %136, %140 : vector<16x32xi1>, vector<16x32xf32>
    %c64 = arith.constant 64 : index
    %c0_50 = arith.constant 0 : index
    %142 = vector.load %arg1[%c64, %c0_50] : memref<224x32xf32, #tpu.memory_space<vmem>>, vector<32x32xf32>
    %cst_51 = arith.constant dense<0.000000e+00> : vector<16x32xf32>
    %143 = tpu.matmul %141, %142, %cst_51 {dimension_numbers = #tpu.dot_dimension_numbers<[1], [0], [0], [1], [0, 0, 1, 1], [], []>} : vector<16x32xf32>, vector<32x32xf32>, vector<16x32xf32> -> vector<16x32xf32>
    %c14 = arith.constant 14 : index
    %c0_52 = arith.constant 0 : index
    %144 = vector.load %arg3[%c14, %c0_52] : memref<33x96xf32, #tpu.memory_space<vmem>>, vector<1x32xf32>
    %145 = vector.broadcast %144 : vector<1x32xf32> to vector<16x32xf32>
    %146 = arith.addf %143, %145 : vector<16x32xf32>
    %c15 = arith.constant 15 : index
    %c0_53 = arith.constant 0 : index
    %147 = vector.load %arg3[%c15, %c0_53] : memref<33x96xf32, #tpu.memory_space<vmem>>, vector<1x32xf32>
    %c16 = arith.constant 16 : index
    %c0_54 = arith.constant 0 : index
    %148 = vector.load %arg3[%c16, %c0_54] : memref<33x96xf32, #tpu.memory_space<vmem>>, vector<1x32xf32>
    %cst_55 = arith.constant dense<0.000000e+00> : vector<16xf32>
    %149 = vector.multi_reduction <add>, %146, %cst_55 [1] : vector<16x32xf32> to vector<16xf32>
    %150 = vector.shape_cast %149 : vector<16xf32> to vector<16x1xf32>
    %cst_56 = arith.constant 3.200000e+01 : f32
    %151 = vector.broadcast %cst_56 : f32 to vector<16x1xf32>
    %152 = arith.divf %150, %151 : vector<16x1xf32>
    %153 = vector.broadcast %152 : vector<16x1xf32> to vector<16x32xf32>
    %154 = arith.subf %146, %153 : vector<16x32xf32>
    %155 = arith.mulf %154, %154 : vector<16x32xf32>
    %cst_57 = arith.constant dense<0.000000e+00> : vector<16xf32>
    %156 = vector.multi_reduction <add>, %155, %cst_57 [1] : vector<16x32xf32> to vector<16xf32>
    %157 = vector.shape_cast %156 : vector<16xf32> to vector<16x1xf32>
    %cst_58 = arith.constant 3.200000e+01 : f32
    %158 = vector.broadcast %cst_58 : f32 to vector<16x1xf32>
    %159 = arith.divf %157, %158 : vector<16x1xf32>
    %160 = vector.broadcast %152 : vector<16x1xf32> to vector<16x32xf32>
    %161 = arith.subf %146, %160 : vector<16x32xf32>
    %cst_59 = arith.constant 9.99999974E-6 : f32
    %162 = vector.broadcast %cst_59 : f32 to vector<16x1xf32>
    %163 = arith.addf %159, %162 : vector<16x1xf32>
    %164 = math.rsqrt %163 : vector<16x1xf32>
    %165 = vector.broadcast %164 : vector<16x1xf32> to vector<16x32xf32>
    %166 = arith.mulf %161, %165 : vector<16x32xf32>
    %167 = vector.broadcast %147 : vector<1x32xf32> to vector<16x32xf32>
    %168 = arith.mulf %166, %167 : vector<16x32xf32>
    %169 = vector.broadcast %148 : vector<1x32xf32> to vector<16x32xf32>
    %170 = arith.addf %168, %169 : vector<16x32xf32>
    %cst_60 = arith.constant 0.000000e+00 : f32
    %171 = vector.broadcast %cst_60 : f32 to vector<16x32xf32>
    %172 = arith.cmpf oge, %170, %171 : vector<16x32xf32>
    %cst_61 = arith.constant 0.00999999977 : f32
    %173 = vector.broadcast %cst_61 : f32 to vector<16x32xf32>
    %174 = arith.mulf %173, %170 : vector<16x32xf32>
    %175 = arith.select %172, %170, %174 : vector<16x32xi1>, vector<16x32xf32>
    %c96 = arith.constant 96 : index
    %c0_62 = arith.constant 0 : index
    %176 = vector.load %arg1[%c96, %c0_62] : memref<224x32xf32, #tpu.memory_space<vmem>>, vector<32x32xf32>
    %cst_63 = arith.constant dense<0.000000e+00> : vector<16x32xf32>
    %177 = tpu.matmul %175, %176, %cst_63 {dimension_numbers = #tpu.dot_dimension_numbers<[1], [0], [0], [1], [0, 0, 1, 1], [], []>} : vector<16x32xf32>, vector<32x32xf32>, vector<16x32xf32> -> vector<16x32xf32>
    %c17 = arith.constant 17 : index
    %c0_64 = arith.constant 0 : index
    %178 = vector.load %arg3[%c17, %c0_64] : memref<33x96xf32, #tpu.memory_space<vmem>>, vector<1x32xf32>
    %179 = vector.broadcast %178 : vector<1x32xf32> to vector<16x32xf32>
    %180 = arith.addf %177, %179 : vector<16x32xf32>
    %c18 = arith.constant 18 : index
    %c0_65 = arith.constant 0 : index
    %181 = vector.load %arg3[%c18, %c0_65] : memref<33x96xf32, #tpu.memory_space<vmem>>, vector<1x32xf32>
    %c19 = arith.constant 19 : index
    %c0_66 = arith.constant 0 : index
    %182 = vector.load %arg3[%c19, %c0_66] : memref<33x96xf32, #tpu.memory_space<vmem>>, vector<1x32xf32>
    %cst_67 = arith.constant dense<0.000000e+00> : vector<16xf32>
    %183 = vector.multi_reduction <add>, %180, %cst_67 [1] : vector<16x32xf32> to vector<16xf32>
    %184 = vector.shape_cast %183 : vector<16xf32> to vector<16x1xf32>
    %cst_68 = arith.constant 3.200000e+01 : f32
    %185 = vector.broadcast %cst_68 : f32 to vector<16x1xf32>
    %186 = arith.divf %184, %185 : vector<16x1xf32>
    %187 = vector.broadcast %186 : vector<16x1xf32> to vector<16x32xf32>
    %188 = arith.subf %180, %187 : vector<16x32xf32>
    %189 = arith.mulf %188, %188 : vector<16x32xf32>
    %cst_69 = arith.constant dense<0.000000e+00> : vector<16xf32>
    %190 = vector.multi_reduction <add>, %189, %cst_69 [1] : vector<16x32xf32> to vector<16xf32>
    %191 = vector.shape_cast %190 : vector<16xf32> to vector<16x1xf32>
    %cst_70 = arith.constant 3.200000e+01 : f32
    %192 = vector.broadcast %cst_70 : f32 to vector<16x1xf32>
    %193 = arith.divf %191, %192 : vector<16x1xf32>
    %194 = vector.broadcast %186 : vector<16x1xf32> to vector<16x32xf32>
    %195 = arith.subf %180, %194 : vector<16x32xf32>
    %cst_71 = arith.constant 9.99999974E-6 : f32
    %196 = vector.broadcast %cst_71 : f32 to vector<16x1xf32>
    %197 = arith.addf %193, %196 : vector<16x1xf32>
    %198 = math.rsqrt %197 : vector<16x1xf32>
    %199 = vector.broadcast %198 : vector<16x1xf32> to vector<16x32xf32>
    %200 = arith.mulf %195, %199 : vector<16x32xf32>
    %201 = vector.broadcast %181 : vector<1x32xf32> to vector<16x32xf32>
    %202 = arith.mulf %200, %201 : vector<16x32xf32>
    %203 = vector.broadcast %182 : vector<1x32xf32> to vector<16x32xf32>
    %204 = arith.addf %202, %203 : vector<16x32xf32>
    %cst_72 = arith.constant 0.000000e+00 : f32
    %205 = vector.broadcast %cst_72 : f32 to vector<16x32xf32>
    %206 = arith.cmpf oge, %204, %205 : vector<16x32xf32>
    %cst_73 = arith.constant 0.00999999977 : f32
    %207 = vector.broadcast %cst_73 : f32 to vector<16x32xf32>
    %208 = arith.mulf %207, %204 : vector<16x32xf32>
    %209 = arith.select %206, %204, %208 : vector<16x32xi1>, vector<16x32xf32>
    %c0_74 = arith.constant 0 : index
    %c0_75 = arith.constant 0 : index
    %210 = vector.load %arg2[%c0_74, %c0_75] : memref<96x96xf32, #tpu.memory_space<vmem>>, vector<32x96xf32>
    %c32_76 = arith.constant 32 : index
    %c0_77 = arith.constant 0 : index
    %211 = vector.load %arg2[%c32_76, %c0_77] : memref<96x96xf32, #tpu.memory_space<vmem>>, vector<32x96xf32>
    %c64_78 = arith.constant 64 : index
    %c0_79 = arith.constant 0 : index
    %212 = vector.load %arg2[%c64_78, %c0_79] : memref<96x96xf32, #tpu.memory_space<vmem>>, vector<32x96xf32>
    %cst_80 = arith.constant dense<0.000000e+00> : vector<16x96xf32>
    %213 = tpu.matmul %105, %210, %cst_80 {dimension_numbers = #tpu.dot_dimension_numbers<[1], [0], [0], [1], [0, 0, 1, 1], [], []>} : vector<16x32xf32>, vector<32x96xf32>, vector<16x96xf32> -> vector<16x96xf32>
    %cst_81 = arith.constant dense<0.000000e+00> : vector<16x96xf32>
    %214 = tpu.matmul %209, %211, %cst_81 {dimension_numbers = #tpu.dot_dimension_numbers<[1], [0], [0], [1], [0, 0, 1, 1], [], []>} : vector<16x32xf32>, vector<32x96xf32>, vector<16x96xf32> -> vector<16x96xf32>
    %215 = arith.addf %213, %214 : vector<16x96xf32>
    %c31 = arith.constant 31 : index
    %c0_82 = arith.constant 0 : index
    %216 = vector.load %arg3[%c31, %c0_82] : memref<33x96xf32, #tpu.memory_space<vmem>>, vector<1x96xf32>
    %217 = vector.broadcast %216 : vector<1x96xf32> to vector<16x96xf32>
    %218 = arith.addf %215, %217 : vector<16x96xf32>
    %c32_83 = arith.constant 32 : index
    %c0_84 = arith.constant 0 : index
    %219 = vector.load %arg3[%c32_83, %c0_84] : memref<33x96xf32, #tpu.memory_space<vmem>>, vector<1x32xf32>
    %220 = vector.shape_cast %219 : vector<1x32xf32> to vector<1x32xf32>
    %221 = vector.broadcast %220 : vector<1x32xf32> to vector<2x32xf32>
    %cst_85 = arith.constant 0.000000e+00 : f32
    %222 = vector.broadcast %cst_85 : f32 to vector<2x32xf32>
    %223 = vector.extract_strided_slice %218 {offsets = [0, 0], sizes = [2, 96], strides = [1, 1]} : vector<16x96xf32> to vector<2x96xf32>
    %cst_86 = arith.constant dense<0.000000e+00> : vector<2x96xf32>
    %224 = tpu.matmul %222, %212, %cst_86 {dimension_numbers = #tpu.dot_dimension_numbers<[1], [0], [0], [1], [0, 0, 1, 1], [], []>} : vector<2x32xf32>, vector<32x96xf32>, vector<2x96xf32> -> vector<2x96xf32>
    %225 = vector.extract_strided_slice %223 {offsets = [0, 0], sizes = [2, 32], strides = [1, 1]} : vector<2x96xf32> to vector<2x32xf32>
    %226 = vector.extract_strided_slice %224 {offsets = [0, 0], sizes = [2, 32], strides = [1, 1]} : vector<2x96xf32> to vector<2x32xf32>
    %227 = arith.addf %225, %226 : vector<2x32xf32>
    %228 = arith.negf %227 : vector<2x32xf32>
    %229 = math.exp %228 : vector<2x32xf32>
    %cst_87 = arith.constant 1.000000e+00 : f32
    %230 = vector.broadcast %cst_87 : f32 to vector<2x32xf32>
    %231 = arith.addf %230, %229 : vector<2x32xf32>
    %232 = arith.divf %230, %231 : vector<2x32xf32>
    %233 = vector.extract_strided_slice %223 {offsets = [0, 32], sizes = [2, 32], strides = [1, 1]} : vector<2x96xf32> to vector<2x32xf32>
    %234 = vector.extract_strided_slice %224 {offsets = [0, 32], sizes = [2, 32], strides = [1, 1]} : vector<2x96xf32> to vector<2x32xf32>
    %235 = arith.addf %233, %234 : vector<2x32xf32>
    %236 = arith.negf %235 : vector<2x32xf32>
    %237 = math.exp %236 : vector<2x32xf32>
    %cst_88 = arith.constant 1.000000e+00 : f32
    %238 = vector.broadcast %cst_88 : f32 to vector<2x32xf32>
    %239 = arith.addf %238, %237 : vector<2x32xf32>
    %240 = arith.divf %238, %239 : vector<2x32xf32>
    %241 = vector.extract_strided_slice %223 {offsets = [0, 64], sizes = [2, 32], strides = [1, 1]} : vector<2x96xf32> to vector<2x32xf32>
    %242 = vector.extract_strided_slice %224 {offsets = [0, 64], sizes = [2, 32], strides = [1, 1]} : vector<2x96xf32> to vector<2x32xf32>
    %243 = arith.addf %242, %221 : vector<2x32xf32>
    %244 = arith.mulf %232, %243 : vector<2x32xf32>
    %245 = arith.addf %241, %244 : vector<2x32xf32>
    %246 = math.tanh %245 : vector<2x32xf32>
    %cst_89 = arith.constant 1.000000e+00 : f32
    %247 = vector.broadcast %cst_89 : f32 to vector<2x32xf32>
    %248 = arith.subf %247, %240 : vector<2x32xf32>
    %249 = arith.mulf %248, %246 : vector<2x32xf32>
    %250 = arith.mulf %240, %222 : vector<2x32xf32>
    %251 = arith.addf %249, %250 : vector<2x32xf32>
    %252 = vector.extract_strided_slice %218 {offsets = [2, 0], sizes = [2, 96], strides = [1, 1]} : vector<16x96xf32> to vector<2x96xf32>
    %cst_90 = arith.constant dense<0.000000e+00> : vector<2x96xf32>
    %253 = tpu.matmul %251, %212, %cst_90 {dimension_numbers = #tpu.dot_dimension_numbers<[1], [0], [0], [1], [0, 0, 1, 1], [], []>} : vector<2x32xf32>, vector<32x96xf32>, vector<2x96xf32> -> vector<2x96xf32>
    %254 = vector.extract_strided_slice %252 {offsets = [0, 0], sizes = [2, 32], strides = [1, 1]} : vector<2x96xf32> to vector<2x32xf32>
    %255 = vector.extract_strided_slice %253 {offsets = [0, 0], sizes = [2, 32], strides = [1, 1]} : vector<2x96xf32> to vector<2x32xf32>
    %256 = arith.addf %254, %255 : vector<2x32xf32>
    %257 = arith.negf %256 : vector<2x32xf32>
    %258 = math.exp %257 : vector<2x32xf32>
    %cst_91 = arith.constant 1.000000e+00 : f32
    %259 = vector.broadcast %cst_91 : f32 to vector<2x32xf32>
    %260 = arith.addf %259, %258 : vector<2x32xf32>
    %261 = arith.divf %259, %260 : vector<2x32xf32>
    %262 = vector.extract_strided_slice %252 {offsets = [0, 32], sizes = [2, 32], strides = [1, 1]} : vector<2x96xf32> to vector<2x32xf32>
    %263 = vector.extract_strided_slice %253 {offsets = [0, 32], sizes = [2, 32], strides = [1, 1]} : vector<2x96xf32> to vector<2x32xf32>
    %264 = arith.addf %262, %263 : vector<2x32xf32>
    %265 = arith.negf %264 : vector<2x32xf32>
    %266 = math.exp %265 : vector<2x32xf32>
    %cst_92 = arith.constant 1.000000e+00 : f32
    %267 = vector.broadcast %cst_92 : f32 to vector<2x32xf32>
    %268 = arith.addf %267, %266 : vector<2x32xf32>
    %269 = arith.divf %267, %268 : vector<2x32xf32>
    %270 = vector.extract_strided_slice %252 {offsets = [0, 64], sizes = [2, 32], strides = [1, 1]} : vector<2x96xf32> to vector<2x32xf32>
    %271 = vector.extract_strided_slice %253 {offsets = [0, 64], sizes = [2, 32], strides = [1, 1]} : vector<2x96xf32> to vector<2x32xf32>
    %272 = arith.addf %271, %221 : vector<2x32xf32>
    %273 = arith.mulf %261, %272 : vector<2x32xf32>
    %274 = arith.addf %270, %273 : vector<2x32xf32>
    %275 = math.tanh %274 : vector<2x32xf32>
    %cst_93 = arith.constant 1.000000e+00 : f32
    %276 = vector.broadcast %cst_93 : f32 to vector<2x32xf32>
    %277 = arith.subf %276, %269 : vector<2x32xf32>
    %278 = arith.mulf %277, %275 : vector<2x32xf32>
    %279 = arith.mulf %269, %251 : vector<2x32xf32>
    %280 = arith.addf %278, %279 : vector<2x32xf32>
    %281 = vector.extract_strided_slice %218 {offsets = [4, 0], sizes = [2, 96], strides = [1, 1]} : vector<16x96xf32> to vector<2x96xf32>
    %cst_94 = arith.constant dense<0.000000e+00> : vector<2x96xf32>
    %282 = tpu.matmul %280, %212, %cst_94 {dimension_numbers = #tpu.dot_dimension_numbers<[1], [0], [0], [1], [0, 0, 1, 1], [], []>} : vector<2x32xf32>, vector<32x96xf32>, vector<2x96xf32> -> vector<2x96xf32>
    %283 = vector.extract_strided_slice %281 {offsets = [0, 0], sizes = [2, 32], strides = [1, 1]} : vector<2x96xf32> to vector<2x32xf32>
    %284 = vector.extract_strided_slice %282 {offsets = [0, 0], sizes = [2, 32], strides = [1, 1]} : vector<2x96xf32> to vector<2x32xf32>
    %285 = arith.addf %283, %284 : vector<2x32xf32>
    %286 = arith.negf %285 : vector<2x32xf32>
    %287 = math.exp %286 : vector<2x32xf32>
    %cst_95 = arith.constant 1.000000e+00 : f32
    %288 = vector.broadcast %cst_95 : f32 to vector<2x32xf32>
    %289 = arith.addf %288, %287 : vector<2x32xf32>
    %290 = arith.divf %288, %289 : vector<2x32xf32>
    %291 = vector.extract_strided_slice %281 {offsets = [0, 32], sizes = [2, 32], strides = [1, 1]} : vector<2x96xf32> to vector<2x32xf32>
    %292 = vector.extract_strided_slice %282 {offsets = [0, 32], sizes = [2, 32], strides = [1, 1]} : vector<2x96xf32> to vector<2x32xf32>
    %293 = arith.addf %291, %292 : vector<2x32xf32>
    %294 = arith.negf %293 : vector<2x32xf32>
    %295 = math.exp %294 : vector<2x32xf32>
    %cst_96 = arith.constant 1.000000e+00 : f32
    %296 = vector.broadcast %cst_96 : f32 to vector<2x32xf32>
    %297 = arith.addf %296, %295 : vector<2x32xf32>
    %298 = arith.divf %296, %297 : vector<2x32xf32>
    %299 = vector.extract_strided_slice %281 {offsets = [0, 64], sizes = [2, 32], strides = [1, 1]} : vector<2x96xf32> to vector<2x32xf32>
    %300 = vector.extract_strided_slice %282 {offsets = [0, 64], sizes = [2, 32], strides = [1, 1]} : vector<2x96xf32> to vector<2x32xf32>
    %301 = arith.addf %300, %221 : vector<2x32xf32>
    %302 = arith.mulf %290, %301 : vector<2x32xf32>
    %303 = arith.addf %299, %302 : vector<2x32xf32>
    %304 = math.tanh %303 : vector<2x32xf32>
    %cst_97 = arith.constant 1.000000e+00 : f32
    %305 = vector.broadcast %cst_97 : f32 to vector<2x32xf32>
    %306 = arith.subf %305, %298 : vector<2x32xf32>
    %307 = arith.mulf %306, %304 : vector<2x32xf32>
    %308 = arith.mulf %298, %280 : vector<2x32xf32>
    %309 = arith.addf %307, %308 : vector<2x32xf32>
    %310 = vector.extract_strided_slice %218 {offsets = [6, 0], sizes = [2, 96], strides = [1, 1]} : vector<16x96xf32> to vector<2x96xf32>
    %cst_98 = arith.constant dense<0.000000e+00> : vector<2x96xf32>
    %311 = tpu.matmul %309, %212, %cst_98 {dimension_numbers = #tpu.dot_dimension_numbers<[1], [0], [0], [1], [0, 0, 1, 1], [], []>} : vector<2x32xf32>, vector<32x96xf32>, vector<2x96xf32> -> vector<2x96xf32>
    %312 = vector.extract_strided_slice %310 {offsets = [0, 0], sizes = [2, 32], strides = [1, 1]} : vector<2x96xf32> to vector<2x32xf32>
    %313 = vector.extract_strided_slice %311 {offsets = [0, 0], sizes = [2, 32], strides = [1, 1]} : vector<2x96xf32> to vector<2x32xf32>
    %314 = arith.addf %312, %313 : vector<2x32xf32>
    %315 = arith.negf %314 : vector<2x32xf32>
    %316 = math.exp %315 : vector<2x32xf32>
    %cst_99 = arith.constant 1.000000e+00 : f32
    %317 = vector.broadcast %cst_99 : f32 to vector<2x32xf32>
    %318 = arith.addf %317, %316 : vector<2x32xf32>
    %319 = arith.divf %317, %318 : vector<2x32xf32>
    %320 = vector.extract_strided_slice %310 {offsets = [0, 32], sizes = [2, 32], strides = [1, 1]} : vector<2x96xf32> to vector<2x32xf32>
    %321 = vector.extract_strided_slice %311 {offsets = [0, 32], sizes = [2, 32], strides = [1, 1]} : vector<2x96xf32> to vector<2x32xf32>
    %322 = arith.addf %320, %321 : vector<2x32xf32>
    %323 = arith.negf %322 : vector<2x32xf32>
    %324 = math.exp %323 : vector<2x32xf32>
    %cst_100 = arith.constant 1.000000e+00 : f32
    %325 = vector.broadcast %cst_100 : f32 to vector<2x32xf32>
    %326 = arith.addf %325, %324 : vector<2x32xf32>
    %327 = arith.divf %325, %326 : vector<2x32xf32>
    %328 = vector.extract_strided_slice %310 {offsets = [0, 64], sizes = [2, 32], strides = [1, 1]} : vector<2x96xf32> to vector<2x32xf32>
    %329 = vector.extract_strided_slice %311 {offsets = [0, 64], sizes = [2, 32], strides = [1, 1]} : vector<2x96xf32> to vector<2x32xf32>
    %330 = arith.addf %329, %221 : vector<2x32xf32>
    %331 = arith.mulf %319, %330 : vector<2x32xf32>
    %332 = arith.addf %328, %331 : vector<2x32xf32>
    %333 = math.tanh %332 : vector<2x32xf32>
    %cst_101 = arith.constant 1.000000e+00 : f32
    %334 = vector.broadcast %cst_101 : f32 to vector<2x32xf32>
    %335 = arith.subf %334, %327 : vector<2x32xf32>
    %336 = arith.mulf %335, %333 : vector<2x32xf32>
    %337 = arith.mulf %327, %309 : vector<2x32xf32>
    %338 = arith.addf %336, %337 : vector<2x32xf32>
    %339 = vector.extract_strided_slice %218 {offsets = [8, 0], sizes = [2, 96], strides = [1, 1]} : vector<16x96xf32> to vector<2x96xf32>
    %cst_102 = arith.constant dense<0.000000e+00> : vector<2x96xf32>
    %340 = tpu.matmul %338, %212, %cst_102 {dimension_numbers = #tpu.dot_dimension_numbers<[1], [0], [0], [1], [0, 0, 1, 1], [], []>} : vector<2x32xf32>, vector<32x96xf32>, vector<2x96xf32> -> vector<2x96xf32>
    %341 = vector.extract_strided_slice %339 {offsets = [0, 0], sizes = [2, 32], strides = [1, 1]} : vector<2x96xf32> to vector<2x32xf32>
    %342 = vector.extract_strided_slice %340 {offsets = [0, 0], sizes = [2, 32], strides = [1, 1]} : vector<2x96xf32> to vector<2x32xf32>
    %343 = arith.addf %341, %342 : vector<2x32xf32>
    %344 = arith.negf %343 : vector<2x32xf32>
    %345 = math.exp %344 : vector<2x32xf32>
    %cst_103 = arith.constant 1.000000e+00 : f32
    %346 = vector.broadcast %cst_103 : f32 to vector<2x32xf32>
    %347 = arith.addf %346, %345 : vector<2x32xf32>
    %348 = arith.divf %346, %347 : vector<2x32xf32>
    %349 = vector.extract_strided_slice %339 {offsets = [0, 32], sizes = [2, 32], strides = [1, 1]} : vector<2x96xf32> to vector<2x32xf32>
    %350 = vector.extract_strided_slice %340 {offsets = [0, 32], sizes = [2, 32], strides = [1, 1]} : vector<2x96xf32> to vector<2x32xf32>
    %351 = arith.addf %349, %350 : vector<2x32xf32>
    %352 = arith.negf %351 : vector<2x32xf32>
    %353 = math.exp %352 : vector<2x32xf32>
    %cst_104 = arith.constant 1.000000e+00 : f32
    %354 = vector.broadcast %cst_104 : f32 to vector<2x32xf32>
    %355 = arith.addf %354, %353 : vector<2x32xf32>
    %356 = arith.divf %354, %355 : vector<2x32xf32>
    %357 = vector.extract_strided_slice %339 {offsets = [0, 64], sizes = [2, 32], strides = [1, 1]} : vector<2x96xf32> to vector<2x32xf32>
    %358 = vector.extract_strided_slice %340 {offsets = [0, 64], sizes = [2, 32], strides = [1, 1]} : vector<2x96xf32> to vector<2x32xf32>
    %359 = arith.addf %358, %221 : vector<2x32xf32>
    %360 = arith.mulf %348, %359 : vector<2x32xf32>
    %361 = arith.addf %357, %360 : vector<2x32xf32>
    %362 = math.tanh %361 : vector<2x32xf32>
    %cst_105 = arith.constant 1.000000e+00 : f32
    %363 = vector.broadcast %cst_105 : f32 to vector<2x32xf32>
    %364 = arith.subf %363, %356 : vector<2x32xf32>
    %365 = arith.mulf %364, %362 : vector<2x32xf32>
    %366 = arith.mulf %356, %338 : vector<2x32xf32>
    %367 = arith.addf %365, %366 : vector<2x32xf32>
    %368 = vector.extract_strided_slice %218 {offsets = [10, 0], sizes = [2, 96], strides = [1, 1]} : vector<16x96xf32> to vector<2x96xf32>
    %cst_106 = arith.constant dense<0.000000e+00> : vector<2x96xf32>
    %369 = tpu.matmul %367, %212, %cst_106 {dimension_numbers = #tpu.dot_dimension_numbers<[1], [0], [0], [1], [0, 0, 1, 1], [], []>} : vector<2x32xf32>, vector<32x96xf32>, vector<2x96xf32> -> vector<2x96xf32>
    %370 = vector.extract_strided_slice %368 {offsets = [0, 0], sizes = [2, 32], strides = [1, 1]} : vector<2x96xf32> to vector<2x32xf32>
    %371 = vector.extract_strided_slice %369 {offsets = [0, 0], sizes = [2, 32], strides = [1, 1]} : vector<2x96xf32> to vector<2x32xf32>
    %372 = arith.addf %370, %371 : vector<2x32xf32>
    %373 = arith.negf %372 : vector<2x32xf32>
    %374 = math.exp %373 : vector<2x32xf32>
    %cst_107 = arith.constant 1.000000e+00 : f32
    %375 = vector.broadcast %cst_107 : f32 to vector<2x32xf32>
    %376 = arith.addf %375, %374 : vector<2x32xf32>
    %377 = arith.divf %375, %376 : vector<2x32xf32>
    %378 = vector.extract_strided_slice %368 {offsets = [0, 32], sizes = [2, 32], strides = [1, 1]} : vector<2x96xf32> to vector<2x32xf32>
    %379 = vector.extract_strided_slice %369 {offsets = [0, 32], sizes = [2, 32], strides = [1, 1]} : vector<2x96xf32> to vector<2x32xf32>
    %380 = arith.addf %378, %379 : vector<2x32xf32>
    %381 = arith.negf %380 : vector<2x32xf32>
    %382 = math.exp %381 : vector<2x32xf32>
    %cst_108 = arith.constant 1.000000e+00 : f32
    %383 = vector.broadcast %cst_108 : f32 to vector<2x32xf32>
    %384 = arith.addf %383, %382 : vector<2x32xf32>
    %385 = arith.divf %383, %384 : vector<2x32xf32>
    %386 = vector.extract_strided_slice %368 {offsets = [0, 64], sizes = [2, 32], strides = [1, 1]} : vector<2x96xf32> to vector<2x32xf32>
    %387 = vector.extract_strided_slice %369 {offsets = [0, 64], sizes = [2, 32], strides = [1, 1]} : vector<2x96xf32> to vector<2x32xf32>
    %388 = arith.addf %387, %221 : vector<2x32xf32>
    %389 = arith.mulf %377, %388 : vector<2x32xf32>
    %390 = arith.addf %386, %389 : vector<2x32xf32>
    %391 = math.tanh %390 : vector<2x32xf32>
    %cst_109 = arith.constant 1.000000e+00 : f32
    %392 = vector.broadcast %cst_109 : f32 to vector<2x32xf32>
    %393 = arith.subf %392, %385 : vector<2x32xf32>
    %394 = arith.mulf %393, %391 : vector<2x32xf32>
    %395 = arith.mulf %385, %367 : vector<2x32xf32>
    %396 = arith.addf %394, %395 : vector<2x32xf32>
    %397 = vector.extract_strided_slice %218 {offsets = [12, 0], sizes = [2, 96], strides = [1, 1]} : vector<16x96xf32> to vector<2x96xf32>
    %cst_110 = arith.constant dense<0.000000e+00> : vector<2x96xf32>
    %398 = tpu.matmul %396, %212, %cst_110 {dimension_numbers = #tpu.dot_dimension_numbers<[1], [0], [0], [1], [0, 0, 1, 1], [], []>} : vector<2x32xf32>, vector<32x96xf32>, vector<2x96xf32> -> vector<2x96xf32>
    %399 = vector.extract_strided_slice %397 {offsets = [0, 0], sizes = [2, 32], strides = [1, 1]} : vector<2x96xf32> to vector<2x32xf32>
    %400 = vector.extract_strided_slice %398 {offsets = [0, 0], sizes = [2, 32], strides = [1, 1]} : vector<2x96xf32> to vector<2x32xf32>
    %401 = arith.addf %399, %400 : vector<2x32xf32>
    %402 = arith.negf %401 : vector<2x32xf32>
    %403 = math.exp %402 : vector<2x32xf32>
    %cst_111 = arith.constant 1.000000e+00 : f32
    %404 = vector.broadcast %cst_111 : f32 to vector<2x32xf32>
    %405 = arith.addf %404, %403 : vector<2x32xf32>
    %406 = arith.divf %404, %405 : vector<2x32xf32>
    %407 = vector.extract_strided_slice %397 {offsets = [0, 32], sizes = [2, 32], strides = [1, 1]} : vector<2x96xf32> to vector<2x32xf32>
    %408 = vector.extract_strided_slice %398 {offsets = [0, 32], sizes = [2, 32], strides = [1, 1]} : vector<2x96xf32> to vector<2x32xf32>
    %409 = arith.addf %407, %408 : vector<2x32xf32>
    %410 = arith.negf %409 : vector<2x32xf32>
    %411 = math.exp %410 : vector<2x32xf32>
    %cst_112 = arith.constant 1.000000e+00 : f32
    %412 = vector.broadcast %cst_112 : f32 to vector<2x32xf32>
    %413 = arith.addf %412, %411 : vector<2x32xf32>
    %414 = arith.divf %412, %413 : vector<2x32xf32>
    %415 = vector.extract_strided_slice %397 {offsets = [0, 64], sizes = [2, 32], strides = [1, 1]} : vector<2x96xf32> to vector<2x32xf32>
    %416 = vector.extract_strided_slice %398 {offsets = [0, 64], sizes = [2, 32], strides = [1, 1]} : vector<2x96xf32> to vector<2x32xf32>
    %417 = arith.addf %416, %221 : vector<2x32xf32>
    %418 = arith.mulf %406, %417 : vector<2x32xf32>
    %419 = arith.addf %415, %418 : vector<2x32xf32>
    %420 = math.tanh %419 : vector<2x32xf32>
    %cst_113 = arith.constant 1.000000e+00 : f32
    %421 = vector.broadcast %cst_113 : f32 to vector<2x32xf32>
    %422 = arith.subf %421, %414 : vector<2x32xf32>
    %423 = arith.mulf %422, %420 : vector<2x32xf32>
    %424 = arith.mulf %414, %396 : vector<2x32xf32>
    %425 = arith.addf %423, %424 : vector<2x32xf32>
    %426 = vector.extract_strided_slice %218 {offsets = [14, 0], sizes = [2, 96], strides = [1, 1]} : vector<16x96xf32> to vector<2x96xf32>
    %cst_114 = arith.constant dense<0.000000e+00> : vector<2x96xf32>
    %427 = tpu.matmul %425, %212, %cst_114 {dimension_numbers = #tpu.dot_dimension_numbers<[1], [0], [0], [1], [0, 0, 1, 1], [], []>} : vector<2x32xf32>, vector<32x96xf32>, vector<2x96xf32> -> vector<2x96xf32>
    %428 = vector.extract_strided_slice %426 {offsets = [0, 0], sizes = [2, 32], strides = [1, 1]} : vector<2x96xf32> to vector<2x32xf32>
    %429 = vector.extract_strided_slice %427 {offsets = [0, 0], sizes = [2, 32], strides = [1, 1]} : vector<2x96xf32> to vector<2x32xf32>
    %430 = arith.addf %428, %429 : vector<2x32xf32>
    %431 = arith.negf %430 : vector<2x32xf32>
    %432 = math.exp %431 : vector<2x32xf32>
    %cst_115 = arith.constant 1.000000e+00 : f32
    %433 = vector.broadcast %cst_115 : f32 to vector<2x32xf32>
    %434 = arith.addf %433, %432 : vector<2x32xf32>
    %435 = arith.divf %433, %434 : vector<2x32xf32>
    %436 = vector.extract_strided_slice %426 {offsets = [0, 32], sizes = [2, 32], strides = [1, 1]} : vector<2x96xf32> to vector<2x32xf32>
    %437 = vector.extract_strided_slice %427 {offsets = [0, 32], sizes = [2, 32], strides = [1, 1]} : vector<2x96xf32> to vector<2x32xf32>
    %438 = arith.addf %436, %437 : vector<2x32xf32>
    %439 = arith.negf %438 : vector<2x32xf32>
    %440 = math.exp %439 : vector<2x32xf32>
    %cst_116 = arith.constant 1.000000e+00 : f32
    %441 = vector.broadcast %cst_116 : f32 to vector<2x32xf32>
    %442 = arith.addf %441, %440 : vector<2x32xf32>
    %443 = arith.divf %441, %442 : vector<2x32xf32>
    %444 = vector.extract_strided_slice %426 {offsets = [0, 64], sizes = [2, 32], strides = [1, 1]} : vector<2x96xf32> to vector<2x32xf32>
    %445 = vector.extract_strided_slice %427 {offsets = [0, 64], sizes = [2, 32], strides = [1, 1]} : vector<2x96xf32> to vector<2x32xf32>
    %446 = arith.addf %445, %221 : vector<2x32xf32>
    %447 = arith.mulf %435, %446 : vector<2x32xf32>
    %448 = arith.addf %444, %447 : vector<2x32xf32>
    %449 = math.tanh %448 : vector<2x32xf32>
    %cst_117 = arith.constant 1.000000e+00 : f32
    %450 = vector.broadcast %cst_117 : f32 to vector<2x32xf32>
    %451 = arith.subf %450, %443 : vector<2x32xf32>
    %452 = arith.mulf %451, %449 : vector<2x32xf32>
    %453 = arith.mulf %443, %425 : vector<2x32xf32>
    %454 = arith.addf %452, %453 : vector<2x32xf32>
    %455 = tpu.concatenate %251, %280, %309, %338, %367, %396, %425, %454 in 0 : vector<2x32xf32>, vector<2x32xf32>, vector<2x32xf32>, vector<2x32xf32>, vector<2x32xf32>, vector<2x32xf32>, vector<2x32xf32>, vector<2x32xf32> -> vector<16x32xf32>
    %c128 = arith.constant 128 : index
    %c0_118 = arith.constant 0 : index
    %456 = vector.load %arg1[%c128, %c0_118] : memref<224x32xf32, #tpu.memory_space<vmem>>, vector<32x32xf32>
    %cst_119 = arith.constant dense<0.000000e+00> : vector<16x32xf32>
    %457 = tpu.matmul %455, %456, %cst_119 {dimension_numbers = #tpu.dot_dimension_numbers<[1], [0], [0], [1], [0, 0, 1, 1], [], []>} : vector<16x32xf32>, vector<32x32xf32>, vector<16x32xf32> -> vector<16x32xf32>
    %c20 = arith.constant 20 : index
    %c0_120 = arith.constant 0 : index
    %458 = vector.load %arg3[%c20, %c0_120] : memref<33x96xf32, #tpu.memory_space<vmem>>, vector<1x32xf32>
    %459 = vector.broadcast %0 : vector<16x1xf32> to vector<16x32xf32>
    %460 = vector.broadcast %458 : vector<1x32xf32> to vector<16x32xf32>
    %461 = arith.mulf %459, %460 : vector<16x32xf32>
    %462 = arith.addf %457, %461 : vector<16x32xf32>
    %c21 = arith.constant 21 : index
    %c0_121 = arith.constant 0 : index
    %463 = vector.load %arg3[%c21, %c0_121] : memref<33x96xf32, #tpu.memory_space<vmem>>, vector<1x32xf32>
    %464 = vector.broadcast %1 : vector<16x1xf32> to vector<16x32xf32>
    %465 = vector.broadcast %463 : vector<1x32xf32> to vector<16x32xf32>
    %466 = arith.mulf %464, %465 : vector<16x32xf32>
    %467 = arith.addf %462, %466 : vector<16x32xf32>
    %c22 = arith.constant 22 : index
    %c0_122 = arith.constant 0 : index
    %468 = vector.load %arg3[%c22, %c0_122] : memref<33x96xf32, #tpu.memory_space<vmem>>, vector<1x32xf32>
    %469 = vector.broadcast %468 : vector<1x32xf32> to vector<16x32xf32>
    %470 = arith.addf %467, %469 : vector<16x32xf32>
    %c23 = arith.constant 23 : index
    %c0_123 = arith.constant 0 : index
    %471 = vector.load %arg3[%c23, %c0_123] : memref<33x96xf32, #tpu.memory_space<vmem>>, vector<1x32xf32>
    %c24 = arith.constant 24 : index
    %c0_124 = arith.constant 0 : index
    %472 = vector.load %arg3[%c24, %c0_124] : memref<33x96xf32, #tpu.memory_space<vmem>>, vector<1x32xf32>
    %cst_125 = arith.constant dense<0.000000e+00> : vector<16xf32>
    %473 = vector.multi_reduction <add>, %470, %cst_125 [1] : vector<16x32xf32> to vector<16xf32>
    %474 = vector.shape_cast %473 : vector<16xf32> to vector<16x1xf32>
    %cst_126 = arith.constant 3.200000e+01 : f32
    %475 = vector.broadcast %cst_126 : f32 to vector<16x1xf32>
    %476 = arith.divf %474, %475 : vector<16x1xf32>
    %477 = vector.broadcast %476 : vector<16x1xf32> to vector<16x32xf32>
    %478 = arith.subf %470, %477 : vector<16x32xf32>
    %479 = arith.mulf %478, %478 : vector<16x32xf32>
    %cst_127 = arith.constant dense<0.000000e+00> : vector<16xf32>
    %480 = vector.multi_reduction <add>, %479, %cst_127 [1] : vector<16x32xf32> to vector<16xf32>
    %481 = vector.shape_cast %480 : vector<16xf32> to vector<16x1xf32>
    %cst_128 = arith.constant 3.200000e+01 : f32
    %482 = vector.broadcast %cst_128 : f32 to vector<16x1xf32>
    %483 = arith.divf %481, %482 : vector<16x1xf32>
    %484 = vector.broadcast %476 : vector<16x1xf32> to vector<16x32xf32>
    %485 = arith.subf %470, %484 : vector<16x32xf32>
    %cst_129 = arith.constant 9.99999974E-6 : f32
    %486 = vector.broadcast %cst_129 : f32 to vector<16x1xf32>
    %487 = arith.addf %483, %486 : vector<16x1xf32>
    %488 = math.rsqrt %487 : vector<16x1xf32>
    %489 = vector.broadcast %488 : vector<16x1xf32> to vector<16x32xf32>
    %490 = arith.mulf %485, %489 : vector<16x32xf32>
    %491 = vector.broadcast %471 : vector<1x32xf32> to vector<16x32xf32>
    %492 = arith.mulf %490, %491 : vector<16x32xf32>
    %493 = vector.broadcast %472 : vector<1x32xf32> to vector<16x32xf32>
    %494 = arith.addf %492, %493 : vector<16x32xf32>
    %cst_130 = arith.constant 0.000000e+00 : f32
    %495 = vector.broadcast %cst_130 : f32 to vector<16x32xf32>
    %496 = arith.cmpf oge, %494, %495 : vector<16x32xf32>
    %cst_131 = arith.constant 0.00999999977 : f32
    %497 = vector.broadcast %cst_131 : f32 to vector<16x32xf32>
    %498 = arith.mulf %497, %494 : vector<16x32xf32>
    %499 = arith.select %496, %494, %498 : vector<16x32xi1>, vector<16x32xf32>
    %c160 = arith.constant 160 : index
    %c0_132 = arith.constant 0 : index
    %500 = vector.load %arg1[%c160, %c0_132] : memref<224x32xf32, #tpu.memory_space<vmem>>, vector<32x32xf32>
    %cst_133 = arith.constant dense<0.000000e+00> : vector<16x32xf32>
    %501 = tpu.matmul %499, %500, %cst_133 {dimension_numbers = #tpu.dot_dimension_numbers<[1], [0], [0], [1], [0, 0, 1, 1], [], []>} : vector<16x32xf32>, vector<32x32xf32>, vector<16x32xf32> -> vector<16x32xf32>
    %c25 = arith.constant 25 : index
    %c0_134 = arith.constant 0 : index
    %502 = vector.load %arg3[%c25, %c0_134] : memref<33x96xf32, #tpu.memory_space<vmem>>, vector<1x32xf32>
    %503 = vector.broadcast %502 : vector<1x32xf32> to vector<16x32xf32>
    %504 = arith.addf %501, %503 : vector<16x32xf32>
    %c26 = arith.constant 26 : index
    %c0_135 = arith.constant 0 : index
    %505 = vector.load %arg3[%c26, %c0_135] : memref<33x96xf32, #tpu.memory_space<vmem>>, vector<1x32xf32>
    %c27 = arith.constant 27 : index
    %c0_136 = arith.constant 0 : index
    %506 = vector.load %arg3[%c27, %c0_136] : memref<33x96xf32, #tpu.memory_space<vmem>>, vector<1x32xf32>
    %cst_137 = arith.constant dense<0.000000e+00> : vector<16xf32>
    %507 = vector.multi_reduction <add>, %504, %cst_137 [1] : vector<16x32xf32> to vector<16xf32>
    %508 = vector.shape_cast %507 : vector<16xf32> to vector<16x1xf32>
    %cst_138 = arith.constant 3.200000e+01 : f32
    %509 = vector.broadcast %cst_138 : f32 to vector<16x1xf32>
    %510 = arith.divf %508, %509 : vector<16x1xf32>
    %511 = vector.broadcast %510 : vector<16x1xf32> to vector<16x32xf32>
    %512 = arith.subf %504, %511 : vector<16x32xf32>
    %513 = arith.mulf %512, %512 : vector<16x32xf32>
    %cst_139 = arith.constant dense<0.000000e+00> : vector<16xf32>
    %514 = vector.multi_reduction <add>, %513, %cst_139 [1] : vector<16x32xf32> to vector<16xf32>
    %515 = vector.shape_cast %514 : vector<16xf32> to vector<16x1xf32>
    %cst_140 = arith.constant 3.200000e+01 : f32
    %516 = vector.broadcast %cst_140 : f32 to vector<16x1xf32>
    %517 = arith.divf %515, %516 : vector<16x1xf32>
    %518 = vector.broadcast %510 : vector<16x1xf32> to vector<16x32xf32>
    %519 = arith.subf %504, %518 : vector<16x32xf32>
    %cst_141 = arith.constant 9.99999974E-6 : f32
    %520 = vector.broadcast %cst_141 : f32 to vector<16x1xf32>
    %521 = arith.addf %517, %520 : vector<16x1xf32>
    %522 = math.rsqrt %521 : vector<16x1xf32>
    %523 = vector.broadcast %522 : vector<16x1xf32> to vector<16x32xf32>
    %524 = arith.mulf %519, %523 : vector<16x32xf32>
    %525 = vector.broadcast %505 : vector<1x32xf32> to vector<16x32xf32>
    %526 = arith.mulf %524, %525 : vector<16x32xf32>
    %527 = vector.broadcast %506 : vector<1x32xf32> to vector<16x32xf32>
    %528 = arith.addf %526, %527 : vector<16x32xf32>
    %cst_142 = arith.constant 0.000000e+00 : f32
    %529 = vector.broadcast %cst_142 : f32 to vector<16x32xf32>
    %530 = arith.cmpf oge, %528, %529 : vector<16x32xf32>
    %cst_143 = arith.constant 0.00999999977 : f32
    %531 = vector.broadcast %cst_143 : f32 to vector<16x32xf32>
    %532 = arith.mulf %531, %528 : vector<16x32xf32>
    %533 = arith.select %530, %528, %532 : vector<16x32xi1>, vector<16x32xf32>
    %c192 = arith.constant 192 : index
    %c0_144 = arith.constant 0 : index
    %534 = vector.load %arg1[%c192, %c0_144] : memref<224x32xf32, #tpu.memory_space<vmem>>, vector<32x32xf32>
    %cst_145 = arith.constant dense<0.000000e+00> : vector<16x32xf32>
    %535 = tpu.matmul %533, %534, %cst_145 {dimension_numbers = #tpu.dot_dimension_numbers<[1], [0], [0], [1], [0, 0, 1, 1], [], []>} : vector<16x32xf32>, vector<32x32xf32>, vector<16x32xf32> -> vector<16x32xf32>
    %c28 = arith.constant 28 : index
    %c0_146 = arith.constant 0 : index
    %536 = vector.load %arg3[%c28, %c0_146] : memref<33x96xf32, #tpu.memory_space<vmem>>, vector<1x32xf32>
    %537 = vector.broadcast %536 : vector<1x32xf32> to vector<16x32xf32>
    %538 = arith.addf %535, %537 : vector<16x32xf32>
    %c29 = arith.constant 29 : index
    %c0_147 = arith.constant 0 : index
    %539 = vector.load %arg3[%c29, %c0_147] : memref<33x96xf32, #tpu.memory_space<vmem>>, vector<1x32xf32>
    %c30 = arith.constant 30 : index
    %c0_148 = arith.constant 0 : index
    %540 = vector.load %arg3[%c30, %c0_148] : memref<33x96xf32, #tpu.memory_space<vmem>>, vector<1x32xf32>
    %cst_149 = arith.constant dense<0.000000e+00> : vector<16xf32>
    %541 = vector.multi_reduction <add>, %538, %cst_149 [1] : vector<16x32xf32> to vector<16xf32>
    %542 = vector.shape_cast %541 : vector<16xf32> to vector<16x1xf32>
    %cst_150 = arith.constant 3.200000e+01 : f32
    %543 = vector.broadcast %cst_150 : f32 to vector<16x1xf32>
    %544 = arith.divf %542, %543 : vector<16x1xf32>
    %545 = vector.broadcast %544 : vector<16x1xf32> to vector<16x32xf32>
    %546 = arith.subf %538, %545 : vector<16x32xf32>
    %547 = arith.mulf %546, %546 : vector<16x32xf32>
    %cst_151 = arith.constant dense<0.000000e+00> : vector<16xf32>
    %548 = vector.multi_reduction <add>, %547, %cst_151 [1] : vector<16x32xf32> to vector<16xf32>
    %549 = vector.shape_cast %548 : vector<16xf32> to vector<16x1xf32>
    %cst_152 = arith.constant 3.200000e+01 : f32
    %550 = vector.broadcast %cst_152 : f32 to vector<16x1xf32>
    %551 = arith.divf %549, %550 : vector<16x1xf32>
    %552 = vector.broadcast %544 : vector<16x1xf32> to vector<16x32xf32>
    %553 = arith.subf %538, %552 : vector<16x32xf32>
    %cst_153 = arith.constant 9.99999974E-6 : f32
    %554 = vector.broadcast %cst_153 : f32 to vector<16x1xf32>
    %555 = arith.addf %551, %554 : vector<16x1xf32>
    %556 = math.rsqrt %555 : vector<16x1xf32>
    %557 = vector.broadcast %556 : vector<16x1xf32> to vector<16x32xf32>
    %558 = arith.mulf %553, %557 : vector<16x32xf32>
    %559 = vector.broadcast %539 : vector<1x32xf32> to vector<16x32xf32>
    %560 = arith.mulf %558, %559 : vector<16x32xf32>
    %561 = vector.broadcast %540 : vector<1x32xf32> to vector<16x32xf32>
    %562 = arith.addf %560, %561 : vector<16x32xf32>
    %cst_154 = arith.constant 0.000000e+00 : f32
    %563 = vector.broadcast %cst_154 : f32 to vector<16x32xf32>
    %564 = arith.cmpf oge, %562, %563 : vector<16x32xf32>
    %cst_155 = arith.constant 0.00999999977 : f32
    %565 = vector.broadcast %cst_155 : f32 to vector<16x32xf32>
    %566 = arith.mulf %565, %562 : vector<16x32xf32>
    %567 = arith.select %564, %562, %566 : vector<16x32xi1>, vector<16x32xf32>
    %c0_156 = arith.constant 0 : index
    %c0_157 = arith.constant 0 : index
    %568 = vector.load %arg4[%c0_156, %c0_157] : memref<33x256xf32, #tpu.memory_space<vmem>>, vector<32x256xf32>
    %cst_158 = arith.constant dense<0.000000e+00> : vector<16x256xf32>
    %569 = tpu.matmul %567, %568, %cst_158 {dimension_numbers = #tpu.dot_dimension_numbers<[1], [0], [0], [1], [0, 0, 1, 1], [], []>} : vector<16x32xf32>, vector<32x256xf32>, vector<16x256xf32> -> vector<16x256xf32>
    %c32_159 = arith.constant 32 : index
    %c0_160 = arith.constant 0 : index
    %570 = vector.load %arg4[%c32_159, %c0_160] : memref<33x256xf32, #tpu.memory_space<vmem>>, vector<1x256xf32>
    %571 = vector.broadcast %570 : vector<1x256xf32> to vector<16x256xf32>
    %572 = arith.addf %569, %571 : vector<16x256xf32>
    %c0_161 = arith.constant 0 : index
    %c0_162 = arith.constant 0 : index
    %573 = vector.load %arg5[%c0_161, %c0_162] : memref<16x256xf32, #tpu.memory_space<vmem>>, vector<16x256xf32>
    tpu.vector_store %arg5[%c0_161, %c0_162], %572 {strides = array<i32>} : memref<16x256xf32, #tpu.memory_space<vmem>>, vector<16x256xf32>,
    return
  }
}

</mosaic_0001>

<bundles_post_ra>
// kernel: tpu_custom_call.1
= control target key start
LH: loop header
LB: loop body
LE: loop exit
PB: predicated region body
PF: predicated region fallthrough
CT: control target
= control target key end

     0   :  { %v1787_v1 = vmov 1   ;;  %v1788_v2 = vmov 0   ;;  %s2466_s0 = inlined_call_operand.vmem [shape: f32[16,2], index: 0, kind: input, shape index: {}]   ;;  %s2467_s1 = inlined_call_operand.vmem [shape: f32[224,32], index: 1, kind: input, shape index: {}]   ;;  %s2468_s2 = inlined_call_operand.vmem [shape: f32[96,96], index: 2, kind: input, shape index: {}]   ;;  %s2469_s3 = inlined_call_operand.vmem [shape: f32[33,96], index: 3, kind: input, shape index: {}]   ;;  %s2470_s4 = inlined_call_operand.vmem [shape: f32[33,256], index: 4, kind: input, shape index: {}]   ;;  %s2471_s5 = inlined_call_operand.hbm [shape: f32[16,256], index: 5, kind: output, shape index: {}]  }
   0x1   :  { %v21_v0 = vld [vmem:[%s2466_s0] sm:$0xff]  ;;  %1637 = vset.pattern.permute.xlu0 %v1787_v1  ;;  %1639 = vset.pattern.permute.xlu1 %v1788_v2 }
   0x2   :  { %295 = vperm.xlu0 %1637, %v21_v0   ;;  %1640 = vset.pattern.permute.xlu2 %v1787_v1 }
   0xa   :  { %1638 = vset.pattern.permute.xlu0 %v1788_v2 }
   0xb   :  { %26 = vperm.xlu0 %1638, %v21_v0  }
   0xc   :  { %10 = vsyncpa [#allocation3], 0  ;;  %v1832_v3 = vld [vmem:[%s2469_s3 + $0xa] ss:$0 sm:$0xff]  ;;  %v1837_v4 = vld [vmem:[%s2469_s3 + $0xb] ss:$0 sm:$0xff] }
   0xd   :  { %vm43_vm0 = vcmask 261120   ;;  %v1645_v9 = vld [vmem:[%s2469_s3] ss:$0 sm:$0xff]  ;;  %v1647_v10 = vld [vmem:[%s2469_s3 + $0x1] ss:$0 sm:$0xff]  ;;  %v1789_v15 = vmov 32.0  }
   0xe   :  { %1675 = vrcp.f32 %v1789_v15  ;;  %v1858_v18 = vld [vmem:[%s2466_s0 + $0x8] sm:$0xff]  ;;  %v370_v33 = vld [vmem:[%s2467_s1 + $0x58] sm:$0xff]  ;;  %v369_v34 = vld [vmem:[%s2467_s1 + $0x50] sm:$0xff]  ;;  %s1791_s18 = smov 64   ;;  %s1792_s19 = smov 96  }
   0xf   :  { %391 = vmatpush.msra.mxu2 %v370_v33  ;;  %v368_v35 = vld [vmem:[%s2467_s1 + $0x48] sm:$0xff]  ;;  %v367_v36 = vld [vmem:[%s2467_s1 + $0x40] sm:$0xff]  ;;  %v110_v38 = vld [vmem:[%s2467_s1 + $0x18] sm:$0xff]  ;;  %s1794_s30 = smov 256  }
  0x10   :  { %v109_v39 = vld [vmem:[%s2467_s1 + $0x10] sm:$0xff]  ;;  %131 = vmatpush.msra.mxu0 %v110_v38  ;;  %1624 = vmatpush.msra.mxu1 %v110_v38  ;;  %v108_v42 = vld [vmem:[%s2467_s1 + $0x8] sm:$0xff]  ;;  %v107_v45 = vld [vmem:[%s2467_s1] sm:$0xff] }
  0x11   :  { %392 = vmatpush.msra.mxu2 %v369_v34  ;;  %v1904_v59 = vld [vmem:[%s2469_s3 + $0xc] ss:$0 sm:$0xff]  ;;  %v1909_v63 = vld [vmem:[%s2469_s3 + $0xd] ss:$0 sm:$0xff] }
  0x12   :  { %132 = vmatpush.msra.mxu0 %v109_v39  ;;  %1625 = vmatpush.msra.mxu1 %v109_v39 }
  0x13   :  { %1641 = vset.pattern.permute.xlu0 %v1787_v1  ;;  %393 = vmatpush.msra.mxu2 %v368_v35 }
  0x14   :  { %v1676_v16 = vpop.eup %1675  ;;  %133 = vmatpush.msra.mxu0 %v108_v42  ;;  %1626 = vmatpush.msra.mxu1 %v108_v42 }
  0x15   :  { %v51_v17 = vmul.f32 32.0, %v1676_v16  ;;  %vm55_vm1 = vweird.f32 %v1676_v16  ;;  %394 = vmatpush.msra.mxu2 %v367_v36 }
  0x16   :  { %134 = vmatpush.msra.mxu0 %v107_v45  ;;  %1627 = vmatpush.msra.mxu1 %v107_v45 }
  0x17   :  { %v52_v19 = vsub.f32 1.0, %v51_v17 }
  0x19   :  { %v53_v20 = vmul.f32 %v1676_v16, %v52_v19 }
  0x1b   :  { %v54_v21 = vadd.f32 %v1676_v16, %v53_v20  ;;  %v1925_v20 = vld [vmem:[%s2469_s3 + $0xe] ss:$0 sm:$0xff] }
  0x1d   :  { %v1861_v22 = vsel %vm55_vm1, %v1676_v16, %v54_v21 }
  0x74   :  { %v1839_v5 = vpop.permute.xlu0 %295 }
  0x75   :  { %v303_v6 = vmul.f32 %v1832_v3, %v1839_v5 }
  0x77   :  { %v307_v7 = vadd.f32 %v1837_v4, %v303_v6 }
  0x79   :  { %v311_v8 = vsel %vm43_vm0, %v307_v7, 0.0 }
  0x7a   :  { %312 = vadd.xlane.f32.xlu1 %v311_v8 }
  0x7d   :  { %v1851_v11 = vpop.permute.xlu0 %26 }
  0x7e   :  { %v35_v12 = vmul.f32 %v1645_v9, %v1851_v11 }
  0x80   :  { %v39_v13 = vadd.f32 %v1647_v10, %v35_v12 }
  0x82   :  { %v44_v14 = vsel %vm43_vm0, %v39_v13, 0.0 }
  0x83   :  { %45 = vadd.xlane.f32.xlu1 %v44_v14  ;;  %v1651_v14 = vld [vmem:[%s2469_s3 + $0x3] ss:$0 sm:$0xff] }
  0x9c   :  { %31 = vperm.xlu1 %1639, %v1858_v18  }
  0xed   :  { %v313_v23 = vpop.xlane.xlu1 %312 }
  0xee   :  { %v317_v24 = vmul.f32 %v313_v23, %v1861_v22 }
  0xf0   :  { %v319_v25 = vsub.f32 %v307_v7, %v317_v24  ;;  %v1930_v24 = vld [vmem:[%s2469_s3 + $0x4] ss:$0 sm:$0xff] }
  0xf2   :  { %v321_v26 = vmul.f32 %v319_v25, %v319_v25 }
  0xf4   :  { %v323_v27 = vsel %vm43_vm0, %v321_v26, 0.0 }
  0xf5   :  { %324 = vadd.xlane.f32.xlu2 %v323_v27 }
  0xf6   :  { %v46_v28 = vpop.xlane.xlu1 %45 }
  0xf7   :  { %v57_v29 = vmul.f32 %v1861_v22, %v46_v28 }
  0xf9   :  { %v1866_v30 = vsub.f32 %v39_v13, %v57_v29 }
  0xfb   :  { %v61_v31 = vmul.f32 %v1866_v30, %v1866_v30 }
  0xfd   :  { %v63_v32 = vsel %vm43_vm0, %v61_v31, 0.0 }
  0xfe   :  { %64 = vadd.xlane.f32.xlu2 %v63_v32 }
 0x10e   :  { %v1890_v41 = vpop.permute.xlu1 %31 }
 0x10f   :  { %v36_v44 = vmul.f32 %v1645_v9, %v1890_v41  ;;  %v1650_v9 = vld [vmem:[%s2469_s3 + $0x2] ss:$0 sm:$0xff] }
 0x111   :  { %v40_v46 = vadd.f32 %v1647_v10, %v36_v44 }
 0x113   :  { %v47_v49 = vsel %vm43_vm0, %v40_v46, 0.0 }
 0x114   :  { %48 = vadd.xlane.f32.xlu2 %v47_v49 }
 0x168   :  { %v325_v37 = vpop.xlane.xlu2 %324 }
 0x169   :  { %v329_v40 = vmul.f32 %v325_v37, %v1861_v22 }
 0x16b   :  { %v331_v43 = vadd.f32 1e-05, %v329_v40 }
 0x16d   :  { %1677 = vrsqrt.f32 %v331_v43  ;;  %vm339_vm3 = vweird.f32 %v331_v43 }
 0x171   :  { %v65_v47 = vpop.xlane.xlu2 %64 }
 0x172   :  { %v69_v48 = vmul.f32 %v65_v47, %v1861_v22 }
 0x173   :  { %v1678_v50 = vpop.eup %1677 }
 0x174   :  { %v334_v51 = vmul.f32 %v1678_v50, %v331_v43  ;;  %v71_v52 = vadd.f32 1e-05, %v69_v48  ;;  %vm340_vm2 = vweird.f32 %v1678_v50 }
 0x175   :  { %vm341_vm4 = vmor %vm339_vm3, %vm340_vm2 }
 0x176   :  { %v335_v53 = vmul.f32 %v1678_v50, %v334_v51  ;;  %1679 = vrsqrt.f32 %v71_v52  ;;  %vm79_vm6 = vweird.f32 %v71_v52 }
 0x178   :  { %v336_v54 = vmul.f32 0.5, %v335_v53 }
 0x17a   :  { %v337_v55 = vsub.f32 1.5, %v336_v54 }
 0x17c   :  { %v1680_v56 = vpop.eup %1679  ;;  %v338_v57 = vmul.f32 %v1678_v50, %v337_v55 }
 0x17d   :  { %v74_v58 = vmul.f32 %v1680_v56, %v71_v52  ;;  %vm80_vm5 = vweird.f32 %v1680_v56 }
 0x17e   :  { %v342_v60 = vsel %vm341_vm4, %v1678_v50, %v338_v57  ;;  %vm81_vm8 = vmor %vm79_vm6, %vm80_vm5 }
 0x17f   :  { %v353_v61 = vmul.f32 %v342_v60, %v319_v25  ;;  %v75_v62 = vmul.f32 %v1680_v56, %v74_v58 }
 0x181   :  { %v76_v0 = vmul.f32 0.5, %v75_v62  ;;  %v356_v1 = vmul.f32 %v1904_v59, %v353_v61  ;;  %v463_v61 = vld [vmem:[%s2467_s1 + $0x78] sm:$0xff] }
 0x182   :  { %484 = vmatpush.msra.mxu3 %v463_v61  ;;  %v203_v62 = vld [vmem:[%s2467_s1 + $0x38] sm:$0xff] }
 0x183   :  { %v77_v2 = vsub.f32 1.5, %v76_v0  ;;  %v359_v6 = vadd.f32 %v1909_v63, %v356_v1  ;;  %v202_v0 = vld [vmem:[%s2467_s1 + $0x30] sm:$0xff]  ;;  %224 = vmatpush.msrb.mxu1 %v203_v62  ;;  %v461_v1 = vld [vmem:[%s2467_s1 + $0x68] sm:$0xff] }
 0x185   :  { %v78_v7 = vmul.f32 %v1680_v56, %v77_v2  ;;  %vm361_vm7 = vcmp.ge.f32.partialorder %v359_v6, 0.0  ;;  %v363_v8 = vmul.f32 0.01, %v359_v6  ;;  %v201_v2 = vld [vmem:[%s2467_s1 + $0x28] sm:$0xff]  ;;  %225 = vmatpush.msrb.mxu1 %v202_v0 }
 0x187   :  { %v82_v10 = vsel %vm81_vm8, %v1680_v56, %v78_v7  ;;  %v365_v12 = vsel %vm361_vm7, %v359_v6, %v363_v8  ;;  %v49_v21 = vpop.xlane.xlu2 %48  ;;  %v460_v6 = vld [vmem:[%s2467_s1 + $0x60] sm:$0xff]  ;;  %226 = vmatpush.msrb.mxu1 %v201_v2 }
 0x188   :  { %v93_v13 = vmul.f32 %v82_v10, %v1866_v30  ;;  %1590 = vmatmul.msk.f32.vlgmr.msra.gmra.mxu2 %vm43_vm0, %v365_v12  ;;  %v58_v26 = vmul.f32 %v1861_v22, %v49_v21  ;;  %v200_v8 = vld [vmem:[%s2467_s1 + $0x20] sm:$0xff] }
 0x189   :  { %227 = vmatpush.msrb.mxu1 %v200_v8 }
 0x18a   :  { %v96_v15 = vmul.f32 %v1650_v9, %v93_v13  ;;  %v60_v30 = vsub.f32 %v40_v46, %v58_v26 }
 0x18c   :  { %v99_v16 = vadd.f32 %v1651_v14, %v96_v15  ;;  %v62_v32 = vmul.f32 %v60_v30, %v60_v30 }
 0x18e   :  { %vm101_vm9 = vcmp.ge.f32.partialorder %v99_v16, 0.0  ;;  %v103_v17 = vmul.f32 0.01, %v99_v16  ;;  %v66_v33 = vsel %vm43_vm0, %v62_v32, 0.0 }
 0x190   :  { %v105_v19 = vsel %vm101_vm9, %v99_v16, %v103_v17 }
 0x191   :  { %1586 = vmatmul.msk.f32.vlgmr.msra.gmra.mxu0 %vm43_vm0, %v105_v19 }
 0x20b   :  { %v396_v23 = vpop.f32.mrf.mxu2 }
 0x20c   :  { %v397_v25 = vadd.f32 %v1925_v20, %v396_v23 }
 0x20e   :  { %v136_v27 = vpop.f32.mrf.mxu0  ;;  %v404_v28 = vsel %vm43_vm0, %v397_v25, 0.0 }
 0x20f   :  { %v137_v29 = vadd.f32 %v1930_v24, %v136_v27  ;;  %405 = vadd.xlane.f32.xlu0 %v404_v28 }
 0x211   :  { %v144_v31 = vsel %vm43_vm0, %v137_v29, 0.0 }
 0x212   :  { %145 = vadd.xlane.f32.xlu2 %v144_v31 }
 0x21a   :  { %67 = vadd.xlane.f32.xlu2 %v66_v33 }
 0x282   :  { %v406_v34 = vpop.xlane.xlu0 %405 }
 0x283   :  { %v410_v35 = vmul.f32 %v406_v34, %v1861_v22 }
 0x285   :  { %v1939_v36 = vsub.f32 %v397_v25, %v410_v35  ;;  %v146_v37 = vpop.xlane.xlu2 %145 }
 0x286   :  { %v150_v38 = vmul.f32 %v146_v37, %v1861_v22  ;;  %v1994_v37 = vld [vmem:[%s2469_s3 + $0x10] ss:$0 sm:$0xff] }
 0x287   :  { %v414_v39 = vmul.f32 %v1939_v36, %v1939_v36 }
 0x288   :  { %v1944_v40 = vsub.f32 %v137_v29, %v150_v38  ;;  %v1999_v38 = vld [vmem:[%s2469_s3 + $0x5] ss:$0 sm:$0xff] }
 0x289   :  { %v416_v42 = vsel %vm43_vm0, %v414_v39, 0.0 }
 0x28a   :  { %417 = vadd.xlane.f32.xlu2 %v416_v42  ;;  %v154_v43 = vmul.f32 %v1944_v40, %v1944_v40 }
 0x28c   :  { %v156_v44 = vsel %vm43_vm0, %v154_v43, 0.0 }
 0x28d   :  { %157 = vadd.xlane.f32.xlu1 %v156_v44  ;;  %v68_v45 = vpop.xlane.xlu2 %67 }
 0x28e   :  { %v70_v46 = vmul.f32 %v68_v45, %v1861_v22 }
 0x290   :  { %v72_v47 = vadd.f32 1e-05, %v70_v46 }
 0x292   :  { %1681 = vrsqrt.f32 %v72_v47  ;;  %vm89_vm11 = vweird.f32 %v72_v47 }
 0x298   :  { %v1682_v48 = vpop.eup %1681 }
 0x299   :  { %v84_v49 = vmul.f32 %v1682_v48, %v72_v47  ;;  %vm90_vm10 = vweird.f32 %v1682_v48 }
 0x29a   :  { %vm91_vm12 = vmor %vm89_vm11, %vm90_vm10 }
 0x29b   :  { %v85_v50 = vmul.f32 %v1682_v48, %v84_v49 }
 0x29d   :  { %v86_v51 = vmul.f32 0.5, %v85_v50 }
 0x29f   :  { %v87_v52 = vsub.f32 1.5, %v86_v51 }
 0x2a1   :  { %v88_v53 = vmul.f32 %v1682_v48, %v87_v52 }
 0x2a2   :  { %299 = vperm.xlu2 %1640, %v1858_v18   ;;  %v462_v18 = vld [vmem:[%s2467_s1 + $0x70] sm:$0xff] }
 0x2a3   :  { %v92_v54 = vsel %vm91_vm12, %v1682_v48, %v88_v53  ;;  %485 = vmatpush.msra.mxu3 %v462_v18 }
 0x2a4   :  { %v94_v55 = vmul.f32 %v92_v54, %v60_v30 }
 0x2a5   :  { %486 = vmatpush.msra.mxu3 %v461_v1 }
 0x2a6   :  { %v97_v56 = vmul.f32 %v1650_v9, %v94_v55 }
 0x2a7   :  { %487 = vmatpush.msra.mxu3 %v460_v6 }
 0x2a8   :  { %v100_v57 = vadd.f32 %v1651_v14, %v97_v56 }
 0x2aa   :  { %vm102_vm13 = vcmp.ge.f32.partialorder %v100_v57, 0.0  ;;  %v104_v58 = vmul.f32 0.01, %v100_v57 }
 0x2ac   :  { %v106_v60 = vsel %vm102_vm13, %v100_v57, %v104_v58  ;;  %v2020_v58 = vld [vmem:[%s2469_s3 + $0x7] ss:$0 sm:$0xff] }
 0x2ad   :  { %1587 = vmatmul.msk.f32.vlgmr.msra.gmra.mxu1 %vm43_vm0, %v106_v60 }
 0x2fd   :  { %v418_v7 = vpop.xlane.xlu2 %417 }
 0x2fe   :  { %v422_v9 = vmul.f32 %v418_v7, %v1861_v22 }
 0x300   :  { %v424_v10 = vadd.f32 1e-05, %v422_v9  ;;  %v158_v12 = vpop.xlane.xlu1 %157 }
 0x301   :  { %v162_v13 = vmul.f32 %v158_v12, %v1861_v22 }
 0x302   :  { %1683 = vrsqrt.f32 %v424_v10  ;;  %vm432_vm15 = vweird.f32 %v424_v10 }
 0x303   :  { %v164_v14 = vadd.f32 1e-05, %v162_v13 }
 0x305   :  { %1685 = vrsqrt.f32 %v164_v14  ;;  %v1979_v15 = vpop.permute.xlu2 %299  ;;  %vm172_vm3 = vweird.f32 %v164_v14 }
 0x306   :  { %v304_v16 = vmul.f32 %v1832_v3, %v1979_v15  ;;  %v1988_v3 = vld [vmem:[%s2469_s3 + $0xf] ss:$0 sm:$0xff] }
 0x308   :  { %v1684_v17 = vpop.eup %1683  ;;  %v308_v19 = vadd.f32 %v1837_v4, %v304_v16 }
 0x309   :  { %v427_v21 = vmul.f32 %v1684_v17, %v424_v10  ;;  %vm433_vm14 = vweird.f32 %v1684_v17 }
 0x30a   :  { %v314_v23 = vsel %vm43_vm0, %v308_v19, 0.0  ;;  %vm434_vm1 = vmor %vm432_vm15, %vm433_vm14 }
 0x30b   :  { %v1686_v25 = vpop.eup %1685  ;;  %v428_v26 = vmul.f32 %v1684_v17, %v427_v21  ;;  %315 = vadd.xlane.f32.xlu0 %v314_v23 }
 0x30c   :  { %v167_v27 = vmul.f32 %v1686_v25, %v164_v14  ;;  %vm173_vm2 = vweird.f32 %v1686_v25 }
 0x30d   :  { %v429_v28 = vmul.f32 0.5, %v428_v26  ;;  %vm174_vm4 = vmor %vm172_vm3, %vm173_vm2 }
 0x30e   :  { %v168_v29 = vmul.f32 %v1686_v25, %v167_v27 }
 0x30f   :  { %v430_v30 = vsub.f32 1.5, %v429_v28 }
 0x310   :  { %v169_v31 = vmul.f32 0.5, %v168_v29 }
 0x311   :  { %v431_v32 = vmul.f32 %v1684_v17, %v430_v30 }
 0x312   :  { %v170_v33 = vsub.f32 1.5, %v169_v31 }
 0x313   :  { %v435_v4 = vsel %vm434_vm1, %v1684_v17, %v431_v32 }
 0x314   :  { %v446_v34 = vmul.f32 %v435_v4, %v1939_v36  ;;  %v171_v35 = vmul.f32 %v1686_v25, %v170_v33  ;;  %v2006_v36 = vld [vmem:[%s2469_s3 + $0x6] ss:$0 sm:$0xff] }
 0x316   :  { %v175_v39 = vsel %vm174_vm4, %v1686_v25, %v171_v35  ;;  %v449_v42 = vmul.f32 %v1988_v3, %v446_v34 }
 0x317   :  { %v186_v43 = vmul.f32 %v175_v39, %v1944_v40 }
 0x318   :  { %v452_v44 = vadd.f32 %v1994_v37, %v449_v42 }
 0x319   :  { %v189_v45 = vmul.f32 %v1999_v38, %v186_v43 }
 0x31a   :  { %vm454_vm5 = vcmp.ge.f32.partialorder %v452_v44, 0.0  ;;  %v456_v46 = vmul.f32 0.01, %v452_v44 }
 0x31b   :  { %v192_v47 = vadd.f32 %v2006_v36, %v189_v45  ;;  %v2061_v45 = vld [vmem:[%s2468_s2 + $0x50] sm:$0xff] }
 0x31c   :  { %v458_v48 = vsel %vm454_vm5, %v452_v44, %v456_v46  ;;  %v2056_v44 = vld [vmem:[%s2468_s2 + $0x58] sm:$0xff] }
 0x31d   :  { %1592 = vmatmul.msk.f32.vlgmr.msra.gmra.mxu3 %vm43_vm0, %v458_v48  ;;  %vm194_vm6 = vcmp.ge.f32.partialorder %v192_v47, 0.0  ;;  %v196_v49 = vmul.f32 0.01, %v192_v47  ;;  %644 = vmatpush.msrb.mxu2 %v2056_v44 }
 0x31e   :  { %713 = vmatpush.msrb.mxu3 %v2056_v44 }
 0x31f   :  { %v198_v50 = vsel %vm194_vm6, %v192_v47, %v196_v49  ;;  %v2069_v47 = vld [vmem:[%s2468_s2 + $0x48] sm:$0xff]  ;;  %645 = vmatpush.msrb.mxu2 %v2061_v45  ;;  %v2076_v49 = vld [vmem:[%s2468_s2 + $0x40] sm:$0xff] }
 0x320   :  { %1588 = vmatmul.msk.f32.vlgmr.msrb.gmra.mxu1 %vm43_vm0, %v198_v50  ;;  %714 = vmatpush.msrb.mxu3 %v2061_v45  ;;  %v1790_v50 = vmov 0.0  }
 0x321   :  { %646 = vmatpush.msrb.mxu2 %v2069_v47 }
 0x322   :  { %715 = vmatpush.msrb.mxu3 %v2069_v47 }
 0x323   :  { %647 = vmatpush.msrb.mxu2 %v2076_v49 }
 0x324   :  { %716 = vmatpush.msrb.mxu3 %v2076_v49 }
 0x325   :  { %785 = vmatpush.msra.mxu2 %v2056_v44 }
 0x326   :  { %857 = vmatpush.msra.mxu3 %v2056_v44 }
 0x327   :  { %786 = vmatpush.msra.mxu2 %v2061_v45 }
 0x328   :  { %858 = vmatpush.msra.mxu3 %v2061_v45 }
 0x329   :  { %787 = vmatpush.msra.mxu2 %v2069_v47 }
 0x32a   :  { %v139_v40 = vpop.f32.mrf.mxu1  ;;  %859 = vmatpush.msra.mxu3 %v2069_v47 }
 0x32b   :  { %v140_v51 = vadd.f32 %v1930_v24, %v139_v40  ;;  %v2026_v24 = vld [vmem:[%s2469_s3 + $0x11] ss:$0 sm:$0xff]  ;;  %788 = vmatpush.msra.mxu2 %v2076_v49 }
 0x32c   :  { %860 = vmatpush.msra.mxu3 %v2076_v49 }
 0x32d   :  { %v147_v52 = vsel %vm43_vm0, %v140_v51, 0.0 }
 0x32e   :  { %148 = vadd.xlane.f32.xlu2 %v147_v52  ;;  %v1660_v52 = vld [vmem:[%s2469_s3 + $0x20] ss:$0 sm:$0xff] }
 0x37e   :  { %v316_v53 = vpop.xlane.xlu0 %315 }
 0x37f   :  { %v318_v54 = vmul.f32 %v316_v53, %v1861_v22 }
 0x381   :  { %v320_v55 = vsub.f32 %v308_v19, %v318_v54 }
 0x383   :  { %v322_v56 = vmul.f32 %v320_v55, %v320_v55 }
 0x385   :  { %v326_v57 = vsel %vm43_vm0, %v322_v56, 0.0 }
 0x386   :  { %327 = vadd.xlane.f32.xlu1 %v326_v57 }
 0x39d   :  { %v229_v60 = vpop.f32.mrf.mxu1 }
 0x39e   :  { %v230_v61 = vadd.f32 %v2020_v58, %v229_v60 }
 0x3a0   :  { %v237_v62 = vsel %vm43_vm0, %v230_v61, 0.0  ;;  %v489_v18 = vpop.f32.mrf.mxu3 }
 0x3a1   :  { %238 = vadd.xlane.f32.xlu0 %v237_v62  ;;  %v149_v0 = vpop.xlane.xlu2 %148  ;;  %v490_v1 = vadd.f32 %v2026_v24, %v489_v18 }
 0x3a2   :  { %v151_v2 = vmul.f32 %v149_v0, %v1861_v22 }
 0x3a3   :  { %v497_v7 = vsel %vm43_vm0, %v490_v1, 0.0 }
 0x3a4   :  { %v2031_v6 = vsub.f32 %v140_v51, %v151_v2  ;;  %v555_v2 = vld [vmem:[%s2468_s2 + $0x10] sm:$0xff] }
 0x3a6   :  { %v155_v8 = vmul.f32 %v2031_v6, %v2031_v6 }
 0x3a8   :  { %v159_v9 = vsel %vm43_vm0, %v155_v8, 0.0  ;;  %v559_v8 = vld [vmem:[%s2468_s2 + $0x30] sm:$0xff] }
 0x3a9   :  { %498 = vadd.xlane.f32.xlu0 %v497_v7 }
 0x3b1   :  { %160 = vadd.xlane.f32.xlu0 %v159_v9 }
 0x3f9   :  { %v328_v10 = vpop.xlane.xlu1 %327 }
 0x3fa   :  { %v330_v12 = vmul.f32 %v328_v10, %v1861_v22  ;;  %v558_v10 = vld [vmem:[%s2468_s2 + $0x28] sm:$0xff] }
 0x3fc   :  { %v332_v13 = vadd.f32 1e-05, %v330_v12 }
 0x3fe   :  { %1687 = vrsqrt.f32 %v332_v13  ;;  %vm349_vm8 = vweird.f32 %v332_v13 }
 0x404   :  { %v1688_v14 = vpop.eup %1687 }
 0x405   :  { %v344_v16 = vmul.f32 %v1688_v14, %v332_v13  ;;  %vm350_vm7 = vweird.f32 %v1688_v14  ;;  %v557_v13 = vld [vmem:[%s2468_s2 + $0x20] sm:$0xff] }
 0x406   :  { %vm351_vm9 = vmor %vm349_vm8, %vm350_vm7 }
 0x407   :  { %v345_v17 = vmul.f32 %v1688_v14, %v344_v16 }
 0x409   :  { %v346_v19 = vmul.f32 0.5, %v345_v17 }
 0x40b   :  { %v347_v21 = vsub.f32 1.5, %v346_v19 }
 0x40d   :  { %v348_v23 = vmul.f32 %v1688_v14, %v347_v21 }
 0x40f   :  { %v352_v25 = vsel %vm351_vm9, %v1688_v14, %v348_v23 }
 0x410   :  { %v354_v26 = vmul.f32 %v352_v25, %v320_v55 }
 0x412   :  { %v357_v27 = vmul.f32 %v1904_v59, %v354_v26 }
 0x414   :  { %v239_v28 = vpop.xlane.xlu0 %238  ;;  %v360_v29 = vadd.f32 %v1909_v63, %v357_v27 }
 0x415   :  { %v243_v30 = vmul.f32 %v239_v28, %v1861_v22 }
 0x416   :  { %vm362_vm10 = vcmp.ge.f32.partialorder %v360_v29, 0.0  ;;  %v364_v31 = vmul.f32 0.01, %v360_v29 }
 0x417   :  { %v2041_v32 = vsub.f32 %v230_v61, %v243_v30 }
 0x418   :  { %v366_v33 = vsel %vm362_vm10, %v360_v29, %v364_v31 }
 0x419   :  { %1591 = vmatmul.msk.f32.gmra.mxu2 %vm43_vm0, %v366_v33  ;;  %v247_v4 = vmul.f32 %v2041_v32, %v2041_v32 }
 0x41b   :  { %v249_v34 = vsel %vm43_vm0, %v247_v4, 0.0  ;;  %v2144_v4 = vld [vmem:[%s2469_s3 + $0x8] ss:$0 sm:$0xff] }
 0x41c   :  { %250 = vadd.xlane.f32.xlu1 %v249_v34  ;;  %v499_v35 = vpop.xlane.xlu0 %498 }
 0x41d   :  { %v503_v59 = vmul.f32 %v499_v35, %v1861_v22 }
 0x41f   :  { %v2048_v39 = vsub.f32 %v490_v1, %v503_v59  ;;  %v556_v1 = vld [vmem:[%s2468_s2 + $0x18] sm:$0xff]  ;;  %v2150_v59 = vld [vmem:[%s2469_s3 + $0x9] ss:$0 sm:$0xff] }
 0x420   :  { %612 = vmatpush.msra.mxu1 %v556_v1 }
 0x421   :  { %v507_v63 = vmul.f32 %v2048_v39, %v2048_v39  ;;  %648 = vmatmul.f32.vlgmr.msrb.gmra.mxu2 %v1790_v50 }
 0x422   :  { %1067 = vmatpush.msrb.mxu2 %v2056_v44  ;;  %613 = vmatpush.msra.mxu1 %v555_v2 }
 0x423   :  { %v509_v42 = vsel %vm43_vm0, %v507_v63, 0.0 }
 0x424   :  { %510 = vadd.xlane.f32.xlu0 %v509_v42  ;;  %v161_v43 = vpop.xlane.xlu0 %160  ;;  %1068 = vmatpush.msrb.mxu2 %v2061_v45 }
 0x425   :  { %v163_v46 = vmul.f32 %v161_v43, %v1861_v22 }
 0x426   :  { %1069 = vmatpush.msrb.mxu2 %v2069_v47 }
 0x427   :  { %v165_v48 = vadd.f32 1e-05, %v163_v46 }
 0x428   :  { %1070 = vmatpush.msrb.mxu2 %v2076_v49 }
 0x429   :  { %1689 = vrsqrt.f32 %v165_v48  ;;  %vm182_vm12 = vweird.f32 %v165_v48 }
 0x42f   :  { %v1690_v40 = vpop.eup %1689 }
 0x430   :  { %v177_v51 = vmul.f32 %v1690_v40, %v165_v48  ;;  %vm183_vm11 = vweird.f32 %v1690_v40 }
 0x431   :  { %vm184_vm13 = vmor %vm182_vm12, %vm183_vm11 }
 0x432   :  { %v178_v53 = vmul.f32 %v1690_v40, %v177_v51 }
 0x434   :  { %v179_v54 = vmul.f32 0.5, %v178_v53 }
 0x435   :  { %673 = vrot.lane.b32.xlu1 %v1660_v52, %s1791_s18 }
 0x436   :  { %v180_v55 = vsub.f32 1.5, %v179_v54  ;;  %v2165_v54 = vld [vmem:[%s2469_s3 + $0x13] ss:$0 sm:$0xff] }
 0x438   :  { %v181_v56 = vmul.f32 %v1690_v40, %v180_v55 }
 0x43a   :  { %v185_v57 = vsel %vm184_vm13, %v1690_v40, %v181_v56 }
 0x43b   :  { %v187_v60 = vmul.f32 %v185_v57, %v2031_v6  ;;  %v560_v6 = vld [vmem:[%s2468_s2 + $0x38] sm:$0xff] }
 0x43c   :  { %583 = vmatpush.msrb.mxu0 %v560_v6 }
 0x43d   :  { %v190_v61 = vmul.f32 %v1999_v38, %v187_v60  ;;  %v554_v38 = vld [vmem:[%s2468_s2 + $0x8] sm:$0xff] }
 0x43e   :  { %614 = vmatpush.msra.mxu1 %v554_v38  ;;  %584 = vmatpush.msrb.mxu0 %v559_v8 }
 0x43f   :  { %v193_v62 = vadd.f32 %v2006_v36, %v190_v61  ;;  %v553_v36 = vld [vmem:[%s2468_s2] sm:$0xff] }
 0x440   :  { %615 = vmatpush.msra.mxu1 %v553_v36  ;;  %585 = vmatpush.msrb.mxu0 %v558_v10 }
 0x441   :  { %vm195_vm14 = vcmp.ge.f32.partialorder %v193_v62, 0.0  ;;  %v197_v18 = vmul.f32 0.01, %v193_v62 }
 0x442   :  { %995 = vmatpush.msrb.mxu1 %v2056_v44  ;;  %586 = vmatpush.msrb.mxu0 %v557_v13 }
 0x443   :  { %v199_v0 = vsel %vm195_vm14, %v193_v62, %v197_v18  ;;  %v2178_v18 = vld [vmem:[%s2469_s3 + $0x1f] ss:$0 sm:$0xff] }
 0x444   :  { %1589 = vmatmul.msk.f32.gmra.mxu1 %vm43_vm0, %v199_v0  ;;  %929 = vmatpush.msra.mxu0 %v2056_v44 }
 0x445   :  { %996 = vmatpush.msrb.mxu1 %v2061_v45 }
 0x446   :  { %930 = vmatpush.msra.mxu0 %v2061_v45 }
 0x447   :  { %997 = vmatpush.msrb.mxu1 %v2069_v47 }
 0x448   :  { %931 = vmatpush.msra.mxu0 %v2069_v47 }
 0x449   :  { %998 = vmatpush.msrb.mxu1 %v2076_v49 }
 0x44a   :  { %932 = vmatpush.msra.mxu0 %v2076_v49 }
 0x48f   :  { %v251_v7 = vpop.xlane.xlu1 %250 }
 0x490   :  { %v255_v9 = vmul.f32 %v251_v7, %v1861_v22 }
 0x492   :  { %v257_v12 = vadd.f32 1e-05, %v255_v9 }
 0x494   :  { %1691 = vrsqrt.f32 %v257_v12  ;;  %vm265_vm1 = vweird.f32 %v257_v12 }
 0x497   :  { %v511_v14 = vpop.xlane.xlu0 %510 }
 0x498   :  { %v515_v16 = vmul.f32 %v511_v14, %v1861_v22 }
 0x49a   :  { %v1692_v17 = vpop.eup %1691  ;;  %v517_v19 = vadd.f32 1e-05, %v515_v16 }
 0x49b   :  { %v260_v21 = vmul.f32 %v1692_v17, %v257_v12  ;;  %vm266_vm15 = vweird.f32 %v1692_v17 }
 0x49c   :  { %1693 = vrsqrt.f32 %v517_v19  ;;  %v399_v23 = vpop.f32.mrf.mxu2  ;;  %vm267_vm2 = vmor %vm265_vm1, %vm266_vm15  ;;  %vm525_vm4 = vweird.f32 %v517_v19 }
 0x49d   :  { %v261_v25 = vmul.f32 %v1692_v17, %v260_v21  ;;  %v2137_v26 = vadd.f32 %v1925_v20, %v399_v23 }
 0x49f   :  { %v262_v27 = vmul.f32 0.5, %v261_v25  ;;  %v407_v28 = vsel %vm43_vm0, %v2137_v26, 0.0 }
 0x4a0   :  { %408 = vadd.xlane.f32.xlu1 %v407_v28 }
 0x4a1   :  { %v263_v29 = vsub.f32 1.5, %v262_v27 }
 0x4a2   :  { %v1694_v30 = vpop.eup %1693 }
 0x4a3   :  { %v264_v31 = vmul.f32 %v1692_v17, %v263_v29  ;;  %v520_v33 = vmul.f32 %v1694_v30, %v517_v19  ;;  %vm526_vm3 = vweird.f32 %v1694_v30 }
 0x4a4   :  { %vm527_vm5 = vmor %vm525_vm4, %vm526_vm3  ;;  %v649_v55 = vpop.f32.mrf.mxu2 }
 0x4a5   :  { %v268_v34 = vsel %vm267_vm2, %v1692_v17, %v264_v31  ;;  %v521_v20 = vmul.f32 %v1694_v30, %v520_v33 }
 0x4a6   :  { %v279_v35 = vmul.f32 %v268_v34, %v2041_v32  ;;  %v2157_v32 = vld [vmem:[%s2469_s3 + $0x12] ss:$0 sm:$0xff] }
 0x4a7   :  { %v522_v63 = vmul.f32 0.5, %v521_v20  ;;  %v2159_v51 = vpop.permute.xlu1 %673 }
 0x4a8   :  { %v282_v42 = vmul.f32 %v2144_v4, %v279_v35  ;;  %v676_v57 = vadd.f32 %v2159_v51, %v649_v55 }
 0x4a9   :  { %v523_v43 = vsub.f32 1.5, %v522_v63 }
 0x4aa   :  { %v285_v46 = vadd.f32 %v2150_v59, %v282_v42  ;;  %678 = vrot.lane.b32.xlu0 %v676_v57, %s1791_s18 }
 0x4ab   :  { %v524_v48 = vmul.f32 %v1694_v30, %v523_v43 }
 0x4ac   :  { %vm287_vm6 = vcmp.ge.f32.partialorder %v285_v46, 0.0  ;;  %v289_v50 = vmul.f32 0.01, %v285_v46 }
 0x4ad   :  { %v528_v40 = vsel %vm527_vm5, %v1694_v30, %v524_v48 }
 0x4ae   :  { %v539_v52 = vmul.f32 %v528_v40, %v2048_v39  ;;  %v291_v53 = vsel %vm287_vm6, %v285_v46, %v289_v50 }
 0x4af   :  { %1596 = vmatmul.msk.f32.vlgmr.msra.gmra.mxu1 %vm43_vm0, %v291_v53 }
 0x4b0   :  { %v542_v56 = vmul.f32 %v2157_v32, %v539_v52 }
 0x4b2   :  { %v545_v60 = vadd.f32 %v2165_v54, %v542_v56 }
 0x4b4   :  { %vm547_vm7 = vcmp.ge.f32.partialorder %v545_v60, 0.0  ;;  %v549_v61 = vmul.f32 0.01, %v545_v60 }
 0x4b6   :  { %v551_v39 = vsel %vm547_vm7, %v545_v60, %v549_v61 }
 0x4b7   :  { %1594 = vmatmul.msk.f32.vlgmr.msrb.gmra.mxu0 %vm43_vm0, %v551_v39 }
 0x4c1   :  { %v2173_v62 = vpop.f32.mrf.mxu1 }
 0x513   :  { %v409_v31 = vpop.xlane.xlu1 %408 }
 0x514   :  { %v411_v33 = vmul.f32 %v409_v31, %v1861_v22 }
 0x516   :  { %v413_v34 = vsub.f32 %v2137_v26, %v411_v33 }
 0x518   :  { %v415_v20 = vmul.f32 %v413_v34, %v413_v34 }
 0x51a   :  { %v419_v35 = vsel %vm43_vm0, %v415_v20, 0.0 }
 0x51c   :  { %v679_v21 = vpop.permute.xlu0 %678 }
 0x52c   :  { %v617_v0 = vpop.f32.mrf.mxu1 }
 0x534   :  { %v588_v1 = vpop.f32.mrf.mxu0 }
 0x535   :  { %v618_v2 = vadd.f32 %v617_v0, %v588_v1 }
 0x537   :  { %v2181_v38 = vadd.f32 %v2178_v18, %v618_v2 }
 0x539   :  { %v652_v36 = vadd.f32 %v649_v55, %v2181_v38 }
 0x53b   :  { %v1598_v6 = vmul.f32 -1.442695, %v652_v36 }
 0x53d   :  { %1695 = vpow2.f32 %v1598_v6 }
 0x543   :  { %v1696_v7 = vpop.eup %1695 }
 0x544   :  { %v656_v8 = vadd.f32 1.0, %v1696_v7 }
 0x546   :  { %1697 = vrcp.f32 %v656_v8  ;;  %v668_v13 = vand.u32 2147483648, %v656_v8  ;;  %v666_v16 = vand.u32 2147483647, %v656_v8  ;;  %vm662_vm9 = vweird.f32 %v656_v8 }
 0x548   :  { %v669_v19 = vor.u32 1.1754944e-38, %v668_v13  ;;  %vm667_vm11 = vcmp.eq.f32.partialorder %v666_v16, 8.507059e+37 }
 0x54c   :  { %v1698_v9 = vpop.eup %1697 }
 0x54d   :  { %v658_v10 = vmul.f32 %v1698_v9, %v656_v8  ;;  %vm663_vm8 = vweird.f32 %v1698_v9 }
 0x54e   :  { %vm664_vm10 = vmor %vm662_vm9, %vm663_vm8  ;;  %vm1193_vm9 = vcmask 1041408  }
 0x54f   :  { %v659_v12 = vsub.f32 1.0, %v658_v10 }
 0x551   :  { %v660_v14 = vmul.f32 %v1698_v9, %v659_v12 }
 0x553   :  { %v661_v17 = vadd.f32 %v1698_v9, %v660_v14 }
 0x555   :  { %v665_v23 = vsel %vm664_vm10, %v1698_v9, %v661_v17  ;;  %vm1195_vm10 = vcmask 1043456  }
 0x556   :  { %v670_v25 = vsel %vm667_vm11, %v669_v19, %v665_v23 }
 0x557   :  { %v681_v27 = vmul.f32 %v679_v21, %v670_v25  ;;  %v688_v63 = vsub.f32 1.0, %v670_v25  ;;  %v694_v43 = vmul.f32 0.0, %v670_v25 }
 0x559   :  { %683 = vrot.lane.b32.xlu2 %v681_v27, %s1791_s18 }
 0x5b3   :  { %v684_v28 = vpop.permute.xlu2 %683 }
 0x5b4   :  { %v686_v29 = vadd.f32 %v684_v28, %v2181_v38 }
 0x5b6   :  { %1699 = vtanh.f32 %v686_v29 }
 0x5bc   :  { %v1700_v30 = vpop.eup %1699 }
 0x5bd   :  { %690 = vrot.lane.b32.xlu0 %v1700_v30, %s1792_s19 }
 0x5e7   :  { %420 = vadd.xlane.f32.xlu0 %v419_v35 }
 0x62f   :  { %v691_v42 = vpop.permute.xlu0 %690 }
 0x630   :  { %v693_v46 = vmul.f32 %v691_v42, %v688_v63 }
 0x632   :  { %v2190_v48 = vadd.f32 %v694_v43, %v693_v46 }
 0x634   :  { %697 = vrot.lane.b32.xlu2 %v2190_v48, %s1792_s19 }
 0x65a   :  { %v421_v50 = vpop.xlane.xlu0 %420 }
 0x65b   :  { %v423_v40 = vmul.f32 %v421_v50, %v1861_v22 }
 0x65d   :  { %v425_v52 = vadd.f32 1e-05, %v423_v40 }
 0x65f   :  { %1701 = vrsqrt.f32 %v425_v52  ;;  %vm442_vm13 = vweird.f32 %v425_v52 }
 0x665   :  { %v1702_v53 = vpop.eup %1701 }
 0x666   :  { %v437_v26 = vmul.f32 %v1702_v53, %v425_v52  ;;  %vm443_vm12 = vweird.f32 %v1702_v53 }
 0x667   :  { %vm444_vm14 = vmor %vm442_vm13, %vm443_vm12 }
 0x668   :  { %v438_v55 = vmul.f32 %v1702_v53, %v437_v26 }
 0x66a   :  { %v439_v56 = vmul.f32 0.5, %v438_v55 }
 0x66c   :  { %v440_v57 = vsub.f32 1.5, %v439_v56 }
 0x66e   :  { %v441_v60 = vmul.f32 %v1702_v53, %v440_v57 }
 0x670   :  { %v445_v61 = vsel %vm444_vm14, %v1702_v53, %v441_v60 }
 0x671   :  { %v447_v39 = vmul.f32 %v445_v61, %v413_v34  ;;  %v763_v34 = vrot.slane %v2190_v48, 6 }
 0x673   :  { %v450_v0 = vmul.f32 %v1988_v3, %v447_v39 }
 0x675   :  { %v453_v1 = vadd.f32 %v1994_v37, %v450_v0 }
 0x677   :  { %vm455_vm15 = vcmp.ge.f32.partialorder %v453_v1, 0.0  ;;  %v457_v2 = vmul.f32 0.01, %v453_v1 }
 0x679   :  { %v459_v36 = vsel %vm455_vm15, %v453_v1, %v457_v2 }
 0x67a   :  { %1593 = vmatmul.msk.f32.gmra.mxu3 %vm43_vm0, %v459_v36 }
 0x68e   :  { %v698_v6 = vpop.permute.xlu2 %697 }
 0x68f   :  { %1599 = vmatmul.msk.f32.vlgmr.msrb.gmra.mxu3 %vm43_vm0, %v698_v6 }
 0x690   :  { %1139 = vmatpush.msrb.mxu3 %v2056_v44 }
 0x692   :  { %1140 = vmatpush.msrb.mxu3 %v2061_v45 }
 0x694   :  { %1141 = vmatpush.msrb.mxu3 %v2069_v47 }
 0x696   :  { %1142 = vmatpush.msrb.mxu3 %v2076_v49 }
 0x6fd   :  { %v2203_v7 = vpop.f32.mrf.mxu3 }
 0x712   :  { %v718_v3 = vpop.f32.mrf.mxu3 }
 0x713   :  { %v744_v37 = vadd.f32 %v718_v3, %v2159_v51  ;;  %v722_v9 = vrot.slane %v718_v3, 6 }
 0x715   :  { %v746_v8 = vrot.slane %v744_v37, 6  ;;  %v724_v10 = vadd.f32 %v722_v9, %v2181_v38 }
 0x717   :  { %747 = vrot.lane.b32.xlu2 %v746_v8, %s1791_s18  ;;  %v1600_v12 = vmul.f32 -1.442695, %v724_v10 }
 0x719   :  { %1703 = vpow2.f32 %v1600_v12 }
 0x71f   :  { %v1704_v44 = vpop.eup %1703 }
 0x720   :  { %v728_v13 = vadd.f32 1.0, %v1704_v44  ;;  %v2220_v44 = vadd.f32 %v2026_v24, %v2203_v7 }
 0x722   :  { %1705 = vrcp.f32 %v728_v13  ;;  %v740_v17 = vand.u32 2147483648, %v728_v13  ;;  %vm734_vm2 = vweird.f32 %v728_v13  ;;  %v738_v19 = vand.u32 2147483647, %v728_v13 }
 0x724   :  { %v741_v23 = vor.u32 1.1754944e-38, %v740_v17  ;;  %vm739_vm4 = vcmp.eq.f32.partialorder %v738_v19, 8.507059e+37 }
 0x728   :  { %v1706_v45 = vpop.eup %1705 }
 0x729   :  { %v730_v47 = vmul.f32 %v1706_v45, %v728_v13  ;;  %vm735_vm1 = vweird.f32 %v1706_v45  ;;  %v500_v13 = vsel %vm43_vm0, %v2220_v44, 0.0 }
 0x72a   :  { %vm736_vm3 = vmor %vm734_vm2, %vm735_vm1 }
 0x72b   :  { %v731_v14 = vsub.f32 1.0, %v730_v47 }
 0x72d   :  { %v732_v49 = vmul.f32 %v1706_v45, %v731_v14 }
 0x72f   :  { %v733_v16 = vadd.f32 %v1706_v45, %v732_v49 }
 0x731   :  { %v737_v21 = vsel %vm736_vm3, %v1706_v45, %v733_v16 }
 0x732   :  { %v742_v27 = vsel %vm739_vm4, %v741_v23, %v737_v21  ;;  %vm1197_vm4 = vcmask 1045504  }
 0x733   :  { %v757_v33 = vsub.f32 1.0, %v742_v27  ;;  %v765_v35 = vmul.f32 %v763_v34, %v742_v27 }
 0x771   :  { %v748_v25 = vpop.permute.xlu2 %747 }
 0x772   :  { %v750_v28 = vmul.f32 %v748_v25, %v742_v27 }
 0x774   :  { %752 = vrot.lane.b32.xlu2 %v750_v28, %s1791_s18 }
 0x7ce   :  { %v753_v29 = vpop.permute.xlu2 %752 }
 0x7cf   :  { %v755_v30 = vadd.f32 %v753_v29, %v2181_v38 }
 0x7d1   :  { %1707 = vtanh.f32 %v755_v30 }
 0x7d7   :  { %v1708_v31 = vpop.eup %1707 }
 0x7d8   :  { %759 = vrot.lane.b32.xlu2 %v1708_v31, %s1792_s19 }
 0x832   :  { %v760_v20 = vpop.permute.xlu2 %759 }
 0x833   :  { %v762_v63 = vmul.f32 %v760_v20, %v757_v33 }
 0x835   :  { %v766_v42 = vadd.f32 %v765_v35, %v762_v63 }
 0x837   :  { %v768_v43 = vrot.slane %v766_v42, 2  ;;  %v835_v37 = vrot.slane %v766_v42, 6  ;;  %v1194_v24 = vsel %vm1193_vm9, %v2190_v48, %v766_v42  ;;  %v233_v48 = vadd.f32 %v2020_v58, %v2173_v62 }
 0x839   :  { %769 = vrot.lane.b32.xlu1 %v768_v43, %s1792_s19  ;;  %v240_v29 = vsel %vm43_vm0, %v233_v48, 0.0 }
 0x8ab   :  { %v770_v46 = vpop.permute.xlu1 %769 }
 0x8ac   :  { %1601 = vmatmul.msk.f32.vlgmr.msra.gmra.mxu2 %vm43_vm0, %v770_v46 }
 0x92f   :  { %v790_v50 = vpop.f32.mrf.mxu2 }
 0x930   :  { %v794_v40 = vrot.slane %v790_v50, 4  ;;  %v816_v52 = vadd.f32 %v790_v50, %v2159_v51 }
 0x932   :  { %v796_v53 = vadd.f32 %v794_v40, %v2181_v38  ;;  %v818_v26 = vrot.slane %v816_v52, 4 }
 0x934   :  { %v1602_v55 = vmul.f32 -1.442695, %v796_v53  ;;  %819 = vrot.lane.b32.xlu2 %v818_v26, %s1791_s18 }
 0x936   :  { %1709 = vpow2.f32 %v1602_v55 }
 0x93c   :  { %v1710_v56 = vpop.eup %1709 }
 0x93d   :  { %v800_v57 = vadd.f32 1.0, %v1710_v56 }
 0x93f   :  { %1711 = vrcp.f32 %v800_v57  ;;  %v812_v0 = vand.u32 2147483648, %v800_v57  ;;  %v810_v2 = vand.u32 2147483647, %v800_v57  ;;  %vm806_vm6 = vweird.f32 %v800_v57 }
 0x941   :  { %v813_v6 = vor.u32 1.1754944e-38, %v812_v0  ;;  %vm811_vm8 = vcmp.eq.f32.partialorder %v810_v2, 8.507059e+37 }
 0x945   :  { %v1712_v60 = vpop.eup %1711 }
 0x946   :  { %v802_v61 = vmul.f32 %v1712_v60, %v800_v57  ;;  %vm807_vm5 = vweird.f32 %v1712_v60 }
 0x947   :  { %vm808_vm7 = vmor %vm806_vm6, %vm807_vm5 }
 0x948   :  { %v803_v39 = vsub.f32 1.0, %v802_v61 }
 0x94a   :  { %v804_v1 = vmul.f32 %v1712_v60, %v803_v39 }
 0x94c   :  { %v805_v36 = vadd.f32 %v1712_v60, %v804_v1 }
 0x94e   :  { %v809_v3 = vsel %vm808_vm7, %v1712_v60, %v805_v36 }
 0x94f   :  { %v814_v8 = vsel %vm811_vm8, %v813_v6, %v809_v3 }
 0x950   :  { %v837_v9 = vmul.f32 %v835_v37, %v814_v8  ;;  %v829_v49 = vsub.f32 1.0, %v814_v8 }
 0x98e   :  { %v820_v10 = vpop.permute.xlu2 %819 }
 0x98f   :  { %v822_v12 = vmul.f32 %v820_v10, %v814_v8 }
 0x991   :  { %824 = vrot.lane.b32.xlu0 %v822_v12, %s1791_s18 }
 0x9bb   :  { %501 = vadd.xlane.f32.xlu0 %v500_v13 }
 0xa03   :  { %v825_v45 = vpop.permute.xlu0 %824 }
 0xa04   :  { %v827_v47 = vadd.f32 %v825_v45, %v2181_v38 }
 0xa06   :  { %1713 = vtanh.f32 %v827_v47 }
 0xa0c   :  { %v1714_v14 = vpop.eup %1713 }
 0xa0d   :  { %831 = vrot.lane.b32.xlu2 %v1714_v14, %s1792_s19 }
 0xa2e   :  { %v502_v2 = vpop.xlane.xlu0 %501 }
 0xa2f   :  { %v504_v36 = vmul.f32 %v502_v2, %v1861_v22 }
 0xa31   :  { %v506_v6 = vsub.f32 %v2220_v44, %v504_v36 }
 0xa33   :  { %v508_v3 = vmul.f32 %v506_v6, %v506_v6 }
 0xa35   :  { %v512_v37 = vsel %vm43_vm0, %v508_v3, 0.0 }
 0xa67   :  { %v832_v16 = vpop.permute.xlu2 %831 }
 0xa68   :  { %v834_v17 = vmul.f32 %v832_v16, %v829_v49 }
 0xa6a   :  { %v2226_v19 = vadd.f32 %v837_v9, %v834_v17 }
 0xa6c   :  { %v840_v7 = vrot.slane %v2226_v19, 4  ;;  %v2233_v21 = vsel %vm1195_vm10, %v1194_v24, %v2226_v19  ;;  %v907_v24 = vrot.slane %v2226_v19, 6 }
 0xa6e   :  { %841 = vrot.lane.b32.xlu2 %v840_v7, %s1792_s19 }
 0xac8   :  { %v842_v23 = vpop.permute.xlu2 %841 }
 0xac9   :  { %1603 = vmatmul.msk.f32.vlgmr.msra.gmra.mxu3 %vm43_vm0, %v842_v23 }
 0xb4c   :  { %v862_v25 = vpop.f32.mrf.mxu3 }
 0xb4d   :  { %v888_v27 = vadd.f32 %v862_v25, %v2159_v51  ;;  %v866_v30 = vrot.slane %v862_v25, 2 }
 0xb4f   :  { %v890_v28 = vrot.slane %v888_v27, 2  ;;  %v868_v31 = vadd.f32 %v866_v30, %v2181_v38 }
 0xb51   :  { %891 = vrot.lane.b32.xlu1 %v890_v28, %s1791_s18  ;;  %v1604_v33 = vmul.f32 -1.442695, %v868_v31 }
 0xb53   :  { %1715 = vpow2.f32 %v1604_v33 }
 0xb59   :  { %v1716_v34 = vpop.eup %1715 }
 0xb5a   :  { %v872_v20 = vadd.f32 1.0, %v1716_v34 }
 0xb5c   :  { %1717 = vrcp.f32 %v872_v20  ;;  %v884_v50 = vand.u32 2147483648, %v872_v20  ;;  %vm878_vm12 = vweird.f32 %v872_v20  ;;  %v882_v58 = vand.u32 2147483647, %v872_v20 }
 0xb5e   :  { %v885_v40 = vor.u32 1.1754944e-38, %v884_v50  ;;  %vm883_vm14 = vcmp.eq.f32.partialorder %v882_v58, 8.507059e+37 }
 0xb62   :  { %v1718_v35 = vpop.eup %1717 }
 0xb63   :  { %v874_v63 = vmul.f32 %v1718_v35, %v872_v20  ;;  %vm879_vm11 = vweird.f32 %v1718_v35 }
 0xb64   :  { %vm880_vm13 = vmor %vm878_vm12, %vm879_vm11 }
 0xb65   :  { %v875_v42 = vsub.f32 1.0, %v874_v63 }
 0xb67   :  { %v876_v43 = vmul.f32 %v1718_v35, %v875_v42 }
 0xb69   :  { %v877_v46 = vadd.f32 %v1718_v35, %v876_v43 }
 0xb6b   :  { %v881_v62 = vsel %vm880_vm13, %v1718_v35, %v877_v46 }
 0xb6c   :  { %v886_v53 = vsel %vm883_vm14, %v885_v40, %v881_v62 }
 0xb6d   :  { %v901_v17 = vsub.f32 1.0, %v886_v53  ;;  %v909_v25 = vmul.f32 %v907_v24, %v886_v53 }
 0xb7b   :  { %241 = vadd.xlane.f32.xlu1 %v240_v29 }
 0xbc3   :  { %v892_v52 = vpop.permute.xlu1 %891 }
 0xbc4   :  { %v894_v26 = vmul.f32 %v892_v52, %v886_v53 }
 0xbc6   :  { %896 = vrot.lane.b32.xlu2 %v894_v26, %s1791_s18 }
 0xbee   :  { %v242_v55 = vpop.xlane.xlu1 %241 }
 0xbef   :  { %v244_v56 = vmul.f32 %v242_v55, %v1861_v22 }
 0xbf1   :  { %v246_v57 = vsub.f32 %v233_v48, %v244_v56 }
 0xbf3   :  { %v248_v60 = vmul.f32 %v246_v57, %v246_v57 }
 0xbf5   :  { %v252_v61 = vsel %vm43_vm0, %v248_v60, 0.0 }
 0xbf6   :  { %253 = vadd.xlane.f32.xlu0 %v252_v61 }
 0xc20   :  { %v897_v39 = vpop.permute.xlu2 %896 }
 0xc21   :  { %v899_v0 = vadd.f32 %v897_v39, %v2181_v38 }
 0xc23   :  { %1719 = vtanh.f32 %v899_v0 }
 0xc29   :  { %v1720_v1 = vpop.eup %1719 }
 0xc2a   :  { %903 = vrot.lane.b32.xlu2 %v1720_v1, %s1792_s19 }
 0xc53   :  { %513 = vadd.xlane.f32.xlu2 %v512_v37 }
 0xc69   :  { %v254_v8 = vpop.xlane.xlu0 %253 }
 0xc6a   :  { %v256_v9 = vmul.f32 %v254_v8, %v1861_v22 }
 0xc6c   :  { %v258_v10 = vadd.f32 1e-05, %v256_v9 }
 0xc6e   :  { %1721 = vrsqrt.f32 %v258_v10  ;;  %vm275_vm1 = vweird.f32 %v258_v10 }
 0xc74   :  { %v1722_v12 = vpop.eup %1721 }
 0xc75   :  { %v270_v38 = vmul.f32 %v1722_v12, %v258_v10  ;;  %vm276_vm15 = vweird.f32 %v1722_v12 }
 0xc76   :  { %vm277_vm2 = vmor %vm275_vm1, %vm276_vm15 }
 0xc77   :  { %v271_v13 = vmul.f32 %v1722_v12, %v270_v38 }
 0xc79   :  { %v272_v45 = vmul.f32 0.5, %v271_v13 }
 0xc7b   :  { %v273_v47 = vsub.f32 1.5, %v272_v45 }
 0xc7d   :  { %v274_v14 = vmul.f32 %v1722_v12, %v273_v47 }
 0xc7f   :  { %v278_v49 = vsel %vm277_vm2, %v1722_v12, %v274_v14 }
 0xc80   :  { %v280_v44 = vmul.f32 %v278_v49, %v246_v57 }
 0xc82   :  { %v283_v16 = vmul.f32 %v2144_v4, %v280_v44 }
 0xc84   :  { %v904_v7 = vpop.permute.xlu2 %903  ;;  %v286_v23 = vadd.f32 %v2150_v59, %v283_v16 }
 0xc85   :  { %v906_v27 = vmul.f32 %v904_v7, %v901_v17 }
 0xc86   :  { %vm288_vm3 = vcmp.ge.f32.partialorder %v286_v23, 0.0  ;;  %v290_v28 = vmul.f32 0.01, %v286_v23 }
 0xc87   :  { %v2255_v48 = vadd.f32 %v909_v25, %v906_v27 }
 0xc88   :  { %v292_v29 = vsel %vm288_vm3, %v286_v23, %v290_v28 }
 0xc89   :  { %1597 = vmatmul.msk.f32.gmra.mxu1 %vm43_vm0, %v292_v29  ;;  %v912_v30 = vrot.slane %v2255_v48, 6  ;;  %v2262_v4 = vsel %vm1197_vm4, %v2233_v21, %v2255_v48 }
 0xc8b   :  { %913 = vrot.lane.b32.xlu1 %v912_v30, %s1792_s19 }
 0xcc6   :  { %v514_v59 = vpop.xlane.xlu2 %513 }
 0xcc7   :  { %v516_v19 = vmul.f32 %v514_v59, %v1861_v22 }
 0xcc9   :  { %v518_v31 = vadd.f32 1e-05, %v516_v19 }
 0xccb   :  { %1723 = vrsqrt.f32 %v518_v31  ;;  %vm535_vm6 = vweird.f32 %v518_v31 }
 0xcd1   :  { %v1724_v33 = vpop.eup %1723 }
 0xcd2   :  { %v530_v34 = vmul.f32 %v1724_v33, %v518_v31  ;;  %vm536_vm5 = vweird.f32 %v1724_v33 }
 0xcd3   :  { %vm537_vm7 = vmor %vm535_vm6, %vm536_vm5 }
 0xcd4   :  { %v531_v20 = vmul.f32 %v1724_v33, %v530_v34 }
 0xcd6   :  { %v532_v35 = vmul.f32 0.5, %v531_v20 }
 0xcd8   :  { %v533_v63 = vsub.f32 1.5, %v532_v35 }
 0xcda   :  { %v534_v42 = vmul.f32 %v1724_v33, %v533_v63 }
 0xcdc   :  { %v538_v21 = vsel %vm537_vm7, %v1724_v33, %v534_v42 }
 0xcdd   :  { %v540_v43 = vmul.f32 %v538_v21, %v506_v6 }
 0xcdf   :  { %v543_v46 = vmul.f32 %v2157_v32, %v540_v43 }
 0xce1   :  { %v546_v50 = vadd.f32 %v2165_v54, %v543_v46 }
 0xce3   :  { %vm548_vm8 = vcmp.ge.f32.partialorder %v546_v50, 0.0  ;;  %v550_v58 = vmul.f32 0.01, %v546_v50 }
 0xce5   :  { %v552_v62 = vsel %vm548_vm8, %v546_v50, %v550_v58 }
 0xce6   :  { %1595 = vmatmul.msk.f32.gmra.mxu0 %vm43_vm0, %v552_v62 }
 0xcfd   :  { %v914_v40 = vpop.permute.xlu1 %913 }
 0xcfe   :  { %1605 = vmatmul.msk.f32.vlgmr.msra.gmra.mxu0 %vm43_vm0, %v914_v40 }
 0xd06   :  { %v620_v55 = vpop.f32.mrf.mxu1 }
 0xd63   :  { %v591_v52 = vpop.f32.mrf.mxu0 }
 0xd64   :  { %v621_v56 = vadd.f32 %v620_v55, %v591_v52 }
 0xd66   :  { %v2275_v32 = vadd.f32 %v2178_v18, %v621_v56 }
 0xd7b   :  { %v934_v53 = vpop.f32.mrf.mxu0 }
 0xd7c   :  { %v957_v26 = vadd.f32 %v934_v53, %v2159_v51  ;;  %v937_v54 = vadd.f32 %v934_v53, %v2275_v32 }
 0xd7e   :  { %959 = vrot.lane.b32.xlu0 %v957_v26, %s1791_s18  ;;  %v1606_v57 = vmul.f32 -1.442695, %v937_v54 }
 0xd80   :  { %1725 = vpow2.f32 %v1606_v57 }
 0xd86   :  { %v1726_v60 = vpop.eup %1725 }
 0xd87   :  { %v941_v61 = vadd.f32 1.0, %v1726_v60 }
 0xd89   :  { %1727 = vrcp.f32 %v941_v61  ;;  %v953_v6 = vand.u32 2147483648, %v941_v61  ;;  %vm947_vm12 = vweird.f32 %v941_v61  ;;  %v951_v3 = vand.u32 2147483647, %v941_v61 }
 0xd8b   :  { %v954_v18 = vor.u32 1.1754944e-38, %v953_v6  ;;  %vm952_vm14 = vcmp.eq.f32.partialorder %v951_v3, 8.507059e+37 }
 0xd8f   :  { %v1728_v39 = vpop.eup %1727 }
 0xd90   :  { %v943_v0 = vmul.f32 %v1728_v39, %v941_v61  ;;  %vm948_vm11 = vweird.f32 %v1728_v39 }
 0xd91   :  { %vm949_vm13 = vmor %vm947_vm12, %vm948_vm11 }
 0xd92   :  { %v944_v1 = vsub.f32 1.0, %v943_v0 }
 0xd94   :  { %v945_v2 = vmul.f32 %v1728_v39, %v944_v1 }
 0xd96   :  { %v946_v36 = vadd.f32 %v1728_v39, %v945_v2 }
 0xd98   :  { %v950_v37 = vsel %vm949_vm13, %v1728_v39, %v946_v36 }
 0xd99   :  { %v955_v8 = vsel %vm952_vm14, %v954_v18, %v950_v37 }
 0xd9a   :  { %v969_v45 = vsub.f32 1.0, %v955_v8  ;;  %v976_v14 = vmul.f32 %v955_v8, %v912_v30 }
 0xdf0   :  { %v960_v9 = vpop.permute.xlu0 %959 }
 0xdf1   :  { %v962_v10 = vmul.f32 %v960_v9, %v955_v8 }
 0xdf3   :  { %964 = vrot.lane.b32.xlu2 %v962_v10, %s1791_s18 }
 0xe4d   :  { %v965_v12 = vpop.permute.xlu2 %964 }
 0xe4e   :  { %v967_v38 = vadd.f32 %v965_v12, %v2275_v32 }
 0xe50   :  { %1729 = vtanh.f32 %v967_v38 }
 0xe56   :  { %v1730_v13 = vpop.eup %1729 }
 0xe57   :  { %971 = vrot.lane.b32.xlu0 %v1730_v13, %s1792_s19 }
 0xec9   :  { %v972_v47 = vpop.permute.xlu0 %971 }
 0xeca   :  { %v974_v49 = vmul.f32 %v972_v47, %v969_v45 }
 0xecc   :  { %v2283_v44 = vadd.f32 %v976_v14, %v974_v49 }
 0xece   :  { %979 = vrot.lane.b32.xlu1 %v2283_v44, %s1792_s19  ;;  %v1045_v62 = vrot.slane %v2283_v44, 6 }
 0xf40   :  { %v980_v16 = vpop.permute.xlu1 %979 }
 0xf41   :  { %1607 = vmatmul.msk.f32.vlgmr.msrb.gmra.mxu1 %vm43_vm0, %v980_v16 }
 0xfbe   :  { %v1000_v17 = vpop.f32.mrf.mxu1 }
 0xfbf   :  { %v1026_v24 = vadd.f32 %v1000_v17, %v2159_v51  ;;  %v1004_v23 = vrot.slane %v1000_v17, 6 }
 0xfc1   :  { %v1028_v7 = vrot.slane %v1026_v24, 6  ;;  %v1006_v25 = vadd.f32 %v1004_v23, %v2275_v32 }
 0xfc3   :  { %1029 = vrot.lane.b32.xlu0 %v1028_v7, %s1791_s18  ;;  %v1608_v27 = vmul.f32 -1.442695, %v1006_v25 }
 0xfc5   :  { %1731 = vpow2.f32 %v1608_v27 }
 0xfcb   :  { %v1732_v28 = vpop.eup %1731 }
 0xfcc   :  { %v1010_v48 = vadd.f32 1.0, %v1732_v28 }
 0xfce   :  { %1733 = vrcp.f32 %v1010_v48  ;;  %v1022_v33 = vand.u32 2147483648, %v1010_v48  ;;  %vm1016_vm1 = vweird.f32 %v1010_v48  ;;  %v1020_v34 = vand.u32 2147483647, %v1010_v48 }
 0xfd0   :  { %v1023_v35 = vor.u32 1.1754944e-38, %v1022_v33  ;;  %vm1021_vm3 = vcmp.eq.f32.partialorder %v1020_v34, 8.507059e+37 }
 0xfd4   :  { %v1734_v29 = vpop.eup %1733 }
 0xfd5   :  { %v1012_v30 = vmul.f32 %v1734_v29, %v1010_v48  ;;  %vm1017_vm15 = vweird.f32 %v1734_v29 }
 0xfd6   :  { %vm1018_vm2 = vmor %vm1016_vm1, %vm1017_vm15 }
 0xfd7   :  { %v1013_v59 = vsub.f32 1.0, %v1012_v30 }
 0xfd9   :  { %v1014_v19 = vmul.f32 %v1734_v29, %v1013_v59 }
 0xfdb   :  { %v1015_v31 = vadd.f32 %v1734_v29, %v1014_v19 }
 0xfdd   :  { %v1019_v20 = vsel %vm1018_vm2, %v1734_v29, %v1015_v31 }
 0xfde   :  { %v1024_v42 = vsel %vm1021_vm3, %v1023_v35, %v1019_v20 }
 0xfdf   :  { %v1039_v58 = vsub.f32 1.0, %v1024_v42  ;;  %v1047_v53 = vmul.f32 %v1045_v62, %v1024_v42 }
0x1035   :  { %v1030_v63 = vpop.permute.xlu0 %1029 }
0x1036   :  { %v1032_v21 = vmul.f32 %v1030_v63, %v1024_v42 }
0x1038   :  { %1034 = vrot.lane.b32.xlu1 %v1032_v21, %s1791_s18 }
0x10aa   :  { %v1035_v43 = vpop.permute.xlu1 %1034 }
0x10ab   :  { %v1037_v46 = vadd.f32 %v1035_v43, %v2275_v32 }
0x10ad   :  { %1735 = vtanh.f32 %v1037_v46 }
0x10b3   :  { %v1736_v50 = vpop.eup %1735 }
0x10b4   :  { %1041 = vrot.lane.b32.xlu2 %v1736_v50, %s1792_s19 }
0x110e   :  { %v1042_v40 = vpop.permute.xlu2 %1041 }
0x110f   :  { %v1044_v52 = vmul.f32 %v1042_v40, %v1039_v58 }
0x1111   :  { %v1048_v26 = vadd.f32 %v1047_v53, %v1044_v52  ;;  %v1204_v53 = vld [vmem:[%s2467_s1 + $0x90] sm:$0xff] }
0x1113   :  { %v1050_v55 = vrot.slane %v1048_v26, 2  ;;  %v1117_v17 = vrot.slane %v1048_v26, 6  ;;  %v1199_v27 = vsel %vm1193_vm9, %v2283_v44, %v1048_v26  ;;  %v1203_v26 = vld [vmem:[%s2467_s1 + $0x88] sm:$0xff] }
0x1115   :  { %1051 = vrot.lane.b32.xlu0 %v1050_v55, %s1792_s19  ;;  %v1202_v55 = vld [vmem:[%s2467_s1 + $0x80] sm:$0xff] }
0x1187   :  { %v1052_v56 = vpop.permute.xlu0 %1051 }
0x1188   :  { %1609 = vmatmul.msk.f32.vlgmr.msrb.gmra.mxu2 %vm43_vm0, %v1052_v56 }
0x120b   :  { %v1072_v54 = vpop.f32.mrf.mxu2 }
0x120c   :  { %v1098_v57 = vadd.f32 %v1072_v54, %v2159_v51  ;;  %v1076_v61 = vrot.slane %v1072_v54, 4 }
0x120e   :  { %v1100_v60 = vrot.slane %v1098_v57, 4  ;;  %v1078_v39 = vadd.f32 %v1076_v61, %v2275_v32 }
0x1210   :  { %1101 = vrot.lane.b32.xlu1 %v1100_v60, %s1791_s18  ;;  %v1610_v0 = vmul.f32 -1.442695, %v1078_v39 }
0x1212   :  { %1737 = vpow2.f32 %v1610_v0  ;;  %v1646_v0 = vld [vmem:[%s2469_s3 + $0x14] ss:$0 sm:$0xff] }
0x1218   :  { %v1738_v1 = vpop.eup %1737 }
0x1219   :  { %v1082_v2 = vadd.f32 1.0, %v1738_v1 }
0x121b   :  { %1739 = vrcp.f32 %v1082_v2  ;;  %v1094_v8 = vand.u32 2147483648, %v1082_v2  ;;  %vm1088_vm6 = vweird.f32 %v1082_v2  ;;  %v1092_v9 = vand.u32 2147483647, %v1082_v2 }
0x121d   :  { %v1095_v12 = vor.u32 1.1754944e-38, %v1094_v8  ;;  %vm1093_vm8 = vcmp.eq.f32.partialorder %v1092_v9, 8.507059e+37 }
0x1221   :  { %v1740_v36 = vpop.eup %1739 }
0x1222   :  { %v1084_v6 = vmul.f32 %v1740_v36, %v1082_v2  ;;  %vm1089_vm5 = vweird.f32 %v1740_v36  ;;  %v1643_v2 = vld [vmem:[%s2469_s3 + $0x15] ss:$0 sm:$0xff] }
0x1223   :  { %vm1090_vm7 = vmor %vm1088_vm6, %vm1089_vm5 }
0x1224   :  { %v1085_v3 = vsub.f32 1.0, %v1084_v6 }
0x1226   :  { %v1086_v37 = vmul.f32 %v1740_v36, %v1085_v3  ;;  %v1245_v3 = vmul.f32 %v1643_v2, %v1839_v5 }
0x1228   :  { %v1087_v18 = vadd.f32 %v1740_v36, %v1086_v37 }
0x122a   :  { %v1091_v10 = vsel %vm1090_vm7, %v1740_v36, %v1087_v18  ;;  %v1208_v36 = vmul.f32 %v1646_v0, %v1851_v11 }
0x122b   :  { %v1096_v13 = vsel %vm1093_vm8, %v1095_v12, %v1091_v10 }
0x122c   :  { %v1111_v16 = vsub.f32 1.0, %v1096_v13  ;;  %v1119_v7 = vmul.f32 %v1117_v17, %v1096_v13  ;;  %v1313_v17 = vld [vmem:[%s2467_s1 + $0xb0] sm:$0xff] }
0x1282   :  { %v1102_v38 = vpop.permute.xlu1 %1101 }
0x1283   :  { %v1104_v45 = vmul.f32 %v1102_v38, %v1096_v13 }
0x1285   :  { %1106 = vrot.lane.b32.xlu2 %v1104_v45, %s1791_s18 }
0x12df   :  { %v1107_v47 = vpop.permute.xlu2 %1106 }
0x12e0   :  { %v1109_v14 = vadd.f32 %v1107_v47, %v2275_v32 }
0x12e2   :  { %1741 = vtanh.f32 %v1109_v14 }
0x12e8   :  { %v1742_v49 = vpop.eup %1741 }
0x12e9   :  { %1113 = vrot.lane.b32.xlu0 %v1742_v49, %s1792_s19 }
0x135b   :  { %v1114_v24 = vpop.permute.xlu0 %1113 }
0x135c   :  { %v1116_v23 = vmul.f32 %v1114_v24, %v1111_v16  ;;  %v1314_v16 = vld [vmem:[%s2467_s1 + $0xb8] sm:$0xff]  ;;  %v1312_v24 = vld [vmem:[%s2467_s1 + $0xa8] sm:$0xff] }
0x135d   :  { %1335 = vmatpush.msra.mxu1 %v1314_v16 }
0x135e   :  { %v1120_v25 = vadd.f32 %v1119_v7, %v1116_v23  ;;  %v1311_v7 = vld [vmem:[%s2467_s1 + $0xa0] sm:$0xff] }
0x135f   :  { %1336 = vmatpush.msra.mxu1 %v1313_v17 }
0x1360   :  { %v1122_v28 = vrot.slane %v1120_v25, 4  ;;  %v2306_v48 = vsel %vm1195_vm10, %v1199_v27, %v1120_v25  ;;  %v1189_v62 = vrot.slane %v1120_v25, 6 }
0x1361   :  { %1337 = vmatpush.msra.mxu1 %v1312_v24 }
0x1362   :  { %1123 = vrot.lane.b32.xlu1 %v1122_v28, %s1792_s19 }
0x1363   :  { %1338 = vmatpush.msra.mxu1 %v1311_v7 }
0x13d4   :  { %v1124_v29 = vpop.permute.xlu1 %1123 }
0x13d5   :  { %1611 = vmatmul.msk.f32.vlgmr.msrb.gmra.mxu3 %vm43_vm0, %v1124_v29 }
0x1458   :  { %v1144_v30 = vpop.f32.mrf.mxu3 }
0x1459   :  { %v1148_v59 = vrot.slane %v1144_v30, 2  ;;  %v1170_v19 = vadd.f32 %v1144_v30, %v2159_v51 }
0x145b   :  { %v1150_v31 = vadd.f32 %v1148_v59, %v2275_v32  ;;  %v1172_v33 = vrot.slane %v1170_v19, 2 }
0x145d   :  { %v1612_v34 = vmul.f32 -1.442695, %v1150_v31  ;;  %1173 = vrot.lane.b32.xlu2 %v1172_v33, %s1791_s18  ;;  %v1667_v31 = vld [vmem:[%s2469_s3 + $0x17] ss:$0 sm:$0xff] }
0x145f   :  { %1743 = vpow2.f32 %v1612_v34 }
0x1465   :  { %v1744_v44 = vpop.eup %1743  ;;  %1212 = vrot.lane.b32.xlu2 %v2262_v4, %s1792_s19  ;;  %v1205_v4 = vld [vmem:[%s2467_s1 + $0x98] sm:$0xff] }
0x1466   :  { %v1154_v20 = vadd.f32 1.0, %v1744_v44  ;;  %1232 = vmatpush.msrb.mxu0 %v1205_v4  ;;  %v1668_v44 = vld [vmem:[%s2469_s3 + $0x18] ss:$0 sm:$0xff] }
0x1468   :  { %1745 = vrcp.f32 %v1154_v20  ;;  %v1166_v21 = vand.u32 2147483648, %v1154_v20  ;;  %v1164_v51 = vand.u32 2147483647, %v1154_v20  ;;  %vm1160_vm10 = vweird.f32 %v1154_v20  ;;  %1233 = vmatpush.msrb.mxu0 %v1204_v53 }
0x146a   :  { %v1167_v50 = vor.u32 1.1754944e-38, %v1166_v21  ;;  %vm1165_vm12 = vcmp.eq.f32.partialorder %v1164_v51, 8.507059e+37  ;;  %1234 = vmatpush.msrb.mxu0 %v1203_v26  ;;  %v1209_v21 = vmul.f32 %v1646_v0, %v1890_v41  ;;  %v1246_v51 = vmul.f32 %v1643_v2, %v1979_v15 }
0x146c   :  { %1235 = vmatpush.msrb.mxu0 %v1202_v55 }
0x146e   :  { %v1746_v35 = vpop.eup %1745 }
0x146f   :  { %v1156_v63 = vmul.f32 %v1746_v35, %v1154_v20  ;;  %vm1161_vm9 = vweird.f32 %v1746_v35 }
0x1470   :  { %vm1162_vm11 = vmor %vm1160_vm10, %vm1161_vm9 }
0x1471   :  { %v1157_v42 = vsub.f32 1.0, %v1156_v63 }
0x1473   :  { %v1158_v43 = vmul.f32 %v1746_v35, %v1157_v42 }
0x1475   :  { %v1159_v46 = vadd.f32 %v1746_v35, %v1158_v43 }
0x1477   :  { %v1163_v58 = vsel %vm1162_vm11, %v1746_v35, %v1159_v46 }
0x1478   :  { %v1168_v40 = vsel %vm1165_vm12, %v1167_v50, %v1163_v58 }
0x1479   :  { %v1191_v52 = vmul.f32 %v1189_v62, %v1168_v40  ;;  %v1183_v9 = vsub.f32 1.0, %v1168_v40 }
0x14b7   :  { %v1174_v56 = vpop.permute.xlu2 %1173 }
0x14b8   :  { %v1176_v54 = vmul.f32 %v1174_v56, %v1168_v40  ;;  %v2375_v40 = vld [vmem:[%s2469_s3 + $0x19] ss:$0 sm:$0xff] }
0x14ba   :  { %1178 = vrot.lane.b32.xlu0 %v1176_v54, %s1791_s18  ;;  %s1795_s18 = smov 16  }
0x14bf   :  { %v1213_v57 = vpop.permute.xlu2 %1212 }
0x14c0   :  { %1613 = vmatmul.msk.f32.vlgmr.msrb.gmra.mxu0 %vm43_vm0, %v1213_v57 }
0x152c   :  { %v1179_v60 = vpop.permute.xlu0 %1178 }
0x152d   :  { %v1181_v61 = vadd.f32 %v1179_v60, %v2275_v32  ;;  %v1666_v32 = vld [vmem:[%s2469_s3 + $0x16] ss:$0 sm:$0xff] }
0x152f   :  { %1747 = vtanh.f32 %v1181_v61 }
0x1535   :  { %v1748_v39 = vpop.eup %1747 }
0x1536   :  { %1185 = vrot.lane.b32.xlu1 %v1748_v39, %s1792_s19 }
0x153d   :  { %v1237_v1 = vpop.f32.mrf.mxu0 }
0x153e   :  { %v1238_v6 = vadd.f32 %v1237_v1, %v1208_v36 }
0x1540   :  { %v1247_v37 = vadd.f32 %v1245_v3, %v1238_v6 }
0x1542   :  { %v1251_v18 = vadd.f32 %v1666_v32, %v1247_v37 }
0x1544   :  { %v1255_v8 = vsel %vm43_vm0, %v1251_v18, 0.0 }
0x1560   :  { %1256 = vadd.xlane.f32.xlu1 %v1255_v8 }
0x15a8   :  { %v1186_v10 = vpop.permute.xlu1 %1185 }
0x15a9   :  { %v1188_v12 = vmul.f32 %v1186_v10, %v1183_v9 }
0x15ab   :  { %v1192_v38 = vadd.f32 %v1191_v52, %v1188_v12 }
0x15ad   :  { %v1201_v13 = vsel %vm1197_vm4, %v2306_v48, %v1192_v38 }
0x15ae   :  { %1214 = vrot.lane.b32.xlu0 %v1201_v13, %s1792_s19 }
0x15d3   :  { %v1257_v11 = vpop.xlane.xlu1 %1256 }
0x15d4   :  { %v1261_v5 = vmul.f32 %v1257_v11, %v1861_v22  ;;  %v1407_v11 = vld [vmem:[%s2467_s1 + $0xd8] sm:$0xff] }
0x15d5   :  { %1428 = vmatpush.msra.mxu2 %v1407_v11 }
0x15d6   :  { %v1263_v45 = vsub.f32 %v1251_v18, %v1261_v5  ;;  %v1406_v5 = vld [vmem:[%s2467_s1 + $0xd0] sm:$0xff] }
0x15d7   :  { %1429 = vmatpush.msra.mxu2 %v1406_v5 }
0x15d8   :  { %v1265_v47 = vmul.f32 %v1263_v45, %v1263_v45 }
0x15da   :  { %v1267_v14 = vsel %vm43_vm0, %v1265_v47, 0.0  ;;  %v1404_v47 = vld [vmem:[%s2467_s1 + $0xc0] sm:$0xff] }
0x15db   :  { %1268 = vadd.xlane.f32.xlu0 %v1267_v14 }
0x1620   :  { %v1215_v49 = vpop.permute.xlu0 %1214 }
0x1621   :  { %1614 = vmatmul.msk.f32.gmra.mxu0 %vm43_vm0, %v1215_v49 }
0x164e   :  { %v1269_v23 = vpop.xlane.xlu0 %1268 }
0x164f   :  { %v1273_v25 = vmul.f32 %v1269_v23, %v1861_v22 }
0x1651   :  { %v1275_v27 = vadd.f32 1e-05, %v1273_v25 }
0x1653   :  { %1749 = vrsqrt.f32 %v1275_v27  ;;  %vm1283_vm13 = vweird.f32 %v1275_v27 }
0x1659   :  { %v1750_v28 = vpop.eup %1749 }
0x165a   :  { %v1278_v48 = vmul.f32 %v1750_v28, %v1275_v27  ;;  %vm1284_vm4 = vweird.f32 %v1750_v28 }
0x165b   :  { %vm1285_vm14 = vmor %vm1283_vm13, %vm1284_vm4 }
0x165c   :  { %v1279_v29 = vmul.f32 %v1750_v28, %v1278_v48 }
0x165e   :  { %v1280_v30 = vmul.f32 0.5, %v1279_v29 }
0x1660   :  { %v1281_v59 = vsub.f32 1.5, %v1280_v30  ;;  %v1671_v30 = vld [vmem:[%s2469_s3 + $0x1b] ss:$0 sm:$0xff] }
0x1662   :  { %v1282_v19 = vmul.f32 %v1750_v28, %v1281_v59 }
0x1664   :  { %v1286_v33 = vsel %vm1285_vm14, %v1750_v28, %v1282_v19  ;;  %v1670_v28 = vld [vmem:[%s2469_s3 + $0x1a] ss:$0 sm:$0xff] }
0x1665   :  { %v1297_v34 = vmul.f32 %v1286_v33, %v1263_v45  ;;  %v1405_v45 = vld [vmem:[%s2467_s1 + $0xc8] sm:$0xff]  ;;  %s1574_s1 = sshll.u32 %s2471_s5, 4  ;;  %s1575_s1 = int_to_ptr.hbm [resolvable:$true] %s1574_s1 }
0x1666   :  { %1430 = vmatpush.msra.mxu2 %v1405_v45 }
0x1667   :  { %v1300_v20 = vmul.f32 %v1667_v31, %v1297_v34 }
0x1668   :  { %1431 = vmatpush.msra.mxu2 %v1404_v47 }
0x1669   :  { %v1303_v35 = vadd.f32 %v1668_v44, %v1300_v20 }
0x166b   :  { %vm1305_vm15 = vcmp.ge.f32.partialorder %v1303_v35, 0.0  ;;  %v1307_v63 = vmul.f32 0.01, %v1303_v35 }
0x166d   :  { %v1309_v42 = vsel %vm1305_vm15, %v1303_v35, %v1307_v63  ;;  %v2410_v35 = vld [vmem:[%s2469_s3 + $0x1c] ss:$0 sm:$0xff] }
0x166e   :  { %1615 = vmatmul.msk.f32.vlgmr.msra.gmra.mxu1 %vm43_vm0, %v1309_v42 }
0x169e   :  { %v1240_v43 = vpop.f32.mrf.mxu0 }
0x169f   :  { %v1241_v46 = vadd.f32 %v1240_v43, %v1209_v21 }
0x16a1   :  { %v1248_v50 = vadd.f32 %v1246_v51, %v1241_v46 }
0x16a3   :  { %v1252_v58 = vadd.f32 %v1666_v32, %v1248_v50 }
0x16a5   :  { %v1258_v62 = vsel %vm43_vm0, %v1252_v58, 0.0 }
0x16a6   :  { %1259 = vadd.xlane.f32.xlu2 %v1258_v62 }
0x16eb   :  { %v1340_v52 = vpop.f32.mrf.mxu1 }
0x16ec   :  { %v1341_v4 = vadd.f32 %v2375_v40, %v1340_v52 }
0x16ee   :  { %v1348_v53 = vsel %vm43_vm0, %v1341_v4, 0.0 }
0x16ef   :  { %1349 = vadd.xlane.f32.xlu1 %v1348_v53 }
0x1719   :  { %v1260_v41 = vpop.xlane.xlu2 %1259 }
0x171a   :  { %v1262_v15 = vmul.f32 %v1260_v41, %v1861_v22 }
0x171c   :  { %v1264_v26 = vsub.f32 %v1252_v58, %v1262_v15 }
0x171e   :  { %v1266_v55 = vmul.f32 %v1264_v26, %v1264_v26 }
0x1720   :  { %v1270_v56 = vsel %vm43_vm0, %v1266_v55, 0.0 }
0x1721   :  { %1271 = vadd.xlane.f32.xlu2 %v1270_v56 }
0x1762   :  { %v1350_v54 = vpop.xlane.xlu1 %1349 }
0x1763   :  { %v1354_v57 = vmul.f32 %v1350_v54, %v1861_v22 }
0x1765   :  { %v1356_v60 = vsub.f32 %v1341_v4, %v1354_v57 }
0x1767   :  { %v1358_v61 = vmul.f32 %v1356_v60, %v1356_v60 }
0x1769   :  { %v1360_v39 = vsel %vm43_vm0, %v1358_v61, 0.0 }
0x176a   :  { %1361 = vadd.xlane.f32.xlu0 %v1360_v39 }
0x1794   :  { %v1272_v0 = vpop.xlane.xlu2 %1271 }
0x1795   :  { %v1274_v1 = vmul.f32 %v1272_v0, %v1861_v22 }
0x1797   :  { %v1276_v2 = vadd.f32 1e-05, %v1274_v1 }
0x1799   :  { %1751 = vrsqrt.f32 %v1276_v2  ;;  %vm1293_vm2 = vweird.f32 %v1276_v2 }
0x179f   :  { %v1752_v36 = vpop.eup %1751 }
0x17a0   :  { %v1288_v6 = vmul.f32 %v1752_v36, %v1276_v2  ;;  %vm1294_vm1 = vweird.f32 %v1752_v36 }
0x17a1   :  { %vm1295_vm3 = vmor %vm1293_vm2, %vm1294_vm1 }
0x17a2   :  { %v1289_v3 = vmul.f32 %v1752_v36, %v1288_v6 }
0x17a4   :  { %v1290_v37 = vmul.f32 0.5, %v1289_v3  ;;  %v1503_v3 = vld [vmem:[%s2470_s4 + $0x30] sm:$0xff] }
0x17a5   :  { %1530 = vmatpush.msra.mxu3 %v1503_v3 }
0x17a6   :  { %v1291_v32 = vsub.f32 1.5, %v1290_v37  ;;  %v1504_v37 = vld [vmem:[%s2470_s4 + $0x38] sm:$0xff] }
0x17a7   :  { %1553 = vmatpush.msra.mxu0 %v1504_v37 }
0x17a8   :  { %v1292_v18 = vmul.f32 %v1752_v36, %v1291_v32  ;;  %v1501_v32 = vld [vmem:[%s2470_s4 + $0x20] sm:$0xff] }
0x17a9   :  { %1531 = vmatpush.msra.mxu3 %v1501_v32 }
0x17aa   :  { %v1296_v8 = vsel %vm1295_vm3, %v1752_v36, %v1292_v18  ;;  %v1502_v18 = vld [vmem:[%s2470_s4 + $0x28] sm:$0xff] }
0x17ab   :  { %v1298_v9 = vmul.f32 %v1296_v8, %v1264_v26  ;;  %v1499_v8 = vld [vmem:[%s2470_s4 + $0x10] sm:$0xff]  ;;  %1554 = vmatpush.msra.mxu0 %v1502_v18 }
0x17ac   :  { %1532 = vmatpush.msra.mxu3 %v1499_v8 }
0x17ad   :  { %v1301_v10 = vmul.f32 %v1667_v31, %v1298_v9  ;;  %v1500_v9 = vld [vmem:[%s2470_s4 + $0x18] sm:$0xff] }
0x17ae   :  { %1555 = vmatpush.msra.mxu0 %v1500_v9 }
0x17af   :  { %v1304_v12 = vadd.f32 %v1668_v44, %v1301_v10  ;;  %v1497_v10 = vld [vmem:[%s2470_s4] sm:$0xff] }
0x17b0   :  { %1533 = vmatpush.msra.mxu3 %v1497_v10 }
0x17b1   :  { %vm1306_vm5 = vcmp.ge.f32.partialorder %v1304_v12, 0.0  ;;  %v1308_v38 = vmul.f32 0.01, %v1304_v12 }
0x17b3   :  { %v1310_v13 = vsel %vm1306_vm5, %v1304_v12, %v1308_v38  ;;  %v1498_v12 = vld [vmem:[%s2470_s4 + $0x8] sm:$0xff] }
0x17b4   :  { %1616 = vmatmul.msk.f32.gmra.mxu1 %vm43_vm0, %v1310_v13  ;;  %1556 = vmatpush.msra.mxu0 %v1498_v12 }
0x17dd   :  { %v1362_v14 = vpop.xlane.xlu0 %1361 }
0x17de   :  { %v1366_v49 = vmul.f32 %v1362_v14, %v1861_v22 }
0x17e0   :  { %v1368_v16 = vadd.f32 1e-05, %v1366_v49 }
0x17e2   :  { %1753 = vrsqrt.f32 %v1368_v16  ;;  %vm1376_vm7 = vweird.f32 %v1368_v16 }
0x17e8   :  { %v1754_v17 = vpop.eup %1753 }
0x17e9   :  { %v1371_v24 = vmul.f32 %v1754_v17, %v1368_v16  ;;  %vm1377_vm6 = vweird.f32 %v1754_v17 }
0x17ea   :  { %vm1378_vm8 = vmor %vm1376_vm7, %vm1377_vm6 }
0x17eb   :  { %v1372_v7 = vmul.f32 %v1754_v17, %v1371_v24 }
0x17ed   :  { %v1373_v23 = vmul.f32 0.5, %v1372_v7 }
0x17ef   :  { %v1374_v25 = vsub.f32 1.5, %v1373_v23  ;;  %v1674_v23 = vld [vmem:[%s2469_s3 + $0x1e] ss:$0 sm:$0xff] }
0x17f1   :  { %v1375_v27 = vmul.f32 %v1754_v17, %v1374_v25 }
0x17f3   :  { %v1379_v48 = vsel %vm1378_vm8, %v1754_v17, %v1375_v27  ;;  %v1673_v17 = vld [vmem:[%s2469_s3 + $0x1d] ss:$0 sm:$0xff]  ;;  %s1793_s3 = smov [#allocation2]  }
0x17f4   :  { %v1390_v29 = vmul.f32 %v1379_v48, %v1356_v60 }
0x17f6   :  { %v1393_v59 = vmul.f32 %v1670_v28, %v1390_v29 }
0x17f8   :  { %v1396_v19 = vadd.f32 %v1671_v30, %v1393_v59 }
0x17fa   :  { %vm1398_vm9 = vcmp.ge.f32.partialorder %v1396_v19, 0.0  ;;  %v1400_v31 = vmul.f32 0.01, %v1396_v19 }
0x17fc   :  { %v1402_v33 = vsel %vm1398_vm9, %v1396_v19, %v1400_v31  ;;  %v1619_v19 = vld [vmem:[%s2470_s4 + $0x40] ss:$8 sm:$0x3]  ;;  %s1572_s4 = sshll.u32 %s1793_s3, 4  ;;  %s1573_s4 = int_to_ptr.vmem [resolvable:$true] %s1572_s4 }
0x17fd   :  { %1617 = vmatmul.msk.f32.vlgmr.msra.gmra.mxu2 %vm43_vm0, %v1402_v33  ;;  %v1509_v31 = vperm.slane %v1619_v19, 1 }
0x1831   :  { %v1343_v34 = vpop.f32.mrf.mxu1 }
0x1832   :  { %v1344_v44 = vadd.f32 %v2375_v40, %v1343_v34 }
0x1834   :  { %v1351_v20 = vsel %vm43_vm0, %v1344_v44, 0.0 }
0x1835   :  { %1352 = vadd.xlane.f32.xlu2 %v1351_v20 }
0x1880   :  { %v1433_v63 = vpop.f32.mrf.mxu2 }
0x1881   :  { %v1434_v42 = vadd.f32 %v2410_v35, %v1433_v63 }
0x1883   :  { %v1441_v21 = vsel %vm43_vm0, %v1434_v42, 0.0 }
0x1884   :  { %1442 = vadd.xlane.f32.xlu2 %v1441_v21 }
0x18a8   :  { %v1353_v43 = vpop.xlane.xlu2 %1352 }
0x18a9   :  { %v1355_v51 = vmul.f32 %v1353_v43, %v1861_v22 }
0x18ab   :  { %v1357_v46 = vsub.f32 %v1344_v44, %v1355_v51  ;;  %v1508_v44 = vperm.slane %v1619_v19, 0 }
0x18ad   :  { %v1359_v50 = vmul.f32 %v1357_v46, %v1357_v46 }
0x18af   :  { %v1363_v58 = vsel %vm43_vm0, %v1359_v50, 0.0 }
0x18b0   :  { %1364 = vadd.xlane.f32.xlu1 %v1363_v58 }
0x18f7   :  { %v1443_v62 = vpop.xlane.xlu2 %1442 }
0x18f8   :  { %v1447_v40 = vmul.f32 %v1443_v62, %v1861_v22 }
0x18fa   :  { %v1449_v52 = vsub.f32 %v1434_v42, %v1447_v40 }
0x18fc   :  { %v1451_v4 = vmul.f32 %v1449_v52, %v1449_v52 }
0x18fe   :  { %v1453_v53 = vsel %vm43_vm0, %v1451_v4, 0.0 }
0x18ff   :  { %1454 = vadd.xlane.f32.xlu1 %v1453_v53 }
0x1923   :  { %v1365_v41 = vpop.xlane.xlu1 %1364 }
0x1924   :  { %v1367_v15 = vmul.f32 %v1365_v41, %v1861_v22 }
0x1926   :  { %v1369_v26 = vadd.f32 1e-05, %v1367_v15 }
0x1928   :  { %1755 = vrsqrt.f32 %v1369_v26  ;;  %vm1386_vm11 = vweird.f32 %v1369_v26 }
0x192e   :  { %v1756_v55 = vpop.eup %1755 }
0x192f   :  { %v1381_v56 = vmul.f32 %v1756_v55, %v1369_v26  ;;  %vm1387_vm10 = vweird.f32 %v1756_v55 }
0x1930   :  { %vm1388_vm12 = vmor %vm1386_vm11, %vm1387_vm10 }
0x1931   :  { %v1382_v54 = vmul.f32 %v1756_v55, %v1381_v56 }
0x1933   :  { %v1383_v57 = vmul.f32 0.5, %v1382_v54 }
0x1935   :  { %v1384_v60 = vsub.f32 1.5, %v1383_v57 }
0x1937   :  { %v1385_v61 = vmul.f32 %v1756_v55, %v1384_v60 }
0x1939   :  { %v1389_v39 = vsel %vm1388_vm12, %v1756_v55, %v1385_v61 }
0x193a   :  { %v1391_v0 = vmul.f32 %v1389_v39, %v1357_v46 }
0x193c   :  { %v1394_v1 = vmul.f32 %v1670_v28, %v1391_v0 }
0x193e   :  { %v1397_v2 = vadd.f32 %v1671_v30, %v1394_v1 }
0x1940   :  { %vm1399_vm4 = vcmp.ge.f32.partialorder %v1397_v2, 0.0  ;;  %v1401_v36 = vmul.f32 0.01, %v1397_v2 }
0x1942   :  { %v1403_v6 = vsel %vm1399_vm4, %v1397_v2, %v1401_v36 }
0x1943   :  { %1618 = vmatmul.msk.f32.gmra.mxu2 %vm43_vm0, %v1403_v6 }
0x1972   :  { %v1455_v38 = vpop.xlane.xlu1 %1454 }
0x1973   :  { %v1459_v13 = vmul.f32 %v1455_v38, %v1861_v22 }
0x1975   :  { %v1461_v11 = vadd.f32 1e-05, %v1459_v13 }
0x1977   :  { %1757 = vrsqrt.f32 %v1461_v11  ;;  %vm1469_vm14 = vweird.f32 %v1461_v11 }
0x197d   :  { %v1758_v5 = vpop.eup %1757 }
0x197e   :  { %v1464_v45 = vmul.f32 %v1758_v5, %v1461_v11  ;;  %vm1470_vm13 = vweird.f32 %v1758_v5 }
0x197f   :  { %vm1471_vm15 = vmor %vm1469_vm14, %vm1470_vm13 }
0x1980   :  { %v1465_v47 = vmul.f32 %v1758_v5, %v1464_v45 }
0x1982   :  { %v1466_v14 = vmul.f32 0.5, %v1465_v47 }
0x1984   :  { %v1467_v49 = vsub.f32 1.5, %v1466_v14 }
0x1986   :  { %v1468_v16 = vmul.f32 %v1758_v5, %v1467_v49 }
0x1988   :  { %v1472_v24 = vsel %vm1471_vm15, %v1758_v5, %v1468_v16 }
0x1989   :  { %v1483_v7 = vmul.f32 %v1472_v24, %v1449_v52 }
0x198b   :  { %v1486_v25 = vmul.f32 %v1673_v17, %v1483_v7 }
0x198d   :  { %v1489_v27 = vadd.f32 %v1674_v23, %v1486_v25 }
0x198f   :  { %vm1491_vm1 = vcmp.ge.f32.partialorder %v1489_v27, 0.0  ;;  %v1493_v28 = vmul.f32 0.01, %v1489_v27 }
0x1991   :  { %v1495_v48 = vsel %vm1491_vm1, %v1489_v27, %v1493_v28 }
0x1992   :  { %1620 = vmatmul.msk.f32.vlgmr.msra.gmra.mxu3 %vm43_vm0, %v1495_v48  ;;  %1622 = vmatmul.msk.f32.vlgmr.msra.gmra.mxu0 %vm43_vm0, %v1495_v48 }
0x19c6   :  { %v1436_v29 = vpop.f32.mrf.mxu2 }
0x19c7   :  { %v1437_v30 = vadd.f32 %v2410_v35, %v1436_v29 }
0x19c9   :  { %v1444_v59 = vsel %vm43_vm0, %v1437_v30, 0.0 }
0x19ca   :  { %1445 = vadd.xlane.f32.xlu0 %v1444_v59 }
0x1a0f   :  { %v1558_v33 = vpop.f32.mrf.mxu0 }
0x1a10   :  { %v1559_v34 = vadd.f32 %v1558_v33, %v1509_v31 }
0x1a12   :  { %1565 = vst [vmem:[#allocation2 + $0x8] sm:$0xff] %v1559_v34 }
0x1a15   :  { %v1535_v20 = vpop.f32.mrf.mxu3 }
0x1a16   :  { %v1536_v63 = vadd.f32 %v1535_v20, %v1508_v44 }
0x1a18   :  { %1564 = vst [vmem:[#allocation2] sm:$0xff] %v1536_v63 }
0x1a3d   :  { %v1446_v42 = vpop.xlane.xlu0 %1445 }
0x1a3e   :  { %v1448_v21 = vmul.f32 %v1446_v42, %v1861_v22 }
0x1a40   :  { %v1450_v43 = vsub.f32 %v1437_v30, %v1448_v21 }
0x1a42   :  { %v1452_v35 = vmul.f32 %v1450_v43, %v1450_v43 }
0x1a44   :  { %v1456_v51 = vsel %vm43_vm0, %v1452_v35, 0.0 }
0x1a45   :  { %1457 = vadd.xlane.f32.xlu2 %v1456_v51 }
0x1ab8   :  { %v1458_v46 = vpop.xlane.xlu2 %1457 }
0x1ab9   :  { %v1460_v50 = vmul.f32 %v1458_v46, %v1861_v22 }
0x1abb   :  { %v1462_v58 = vadd.f32 1e-05, %v1460_v50 }
0x1abd   :  { %1759 = vrsqrt.f32 %v1462_v58  ;;  %vm1479_vm3 = vweird.f32 %v1462_v58 }
0x1ac3   :  { %v1760_v62 = vpop.eup %1759 }
0x1ac4   :  { %v1474_v40 = vmul.f32 %v1760_v62, %v1462_v58  ;;  %vm1480_vm2 = vweird.f32 %v1760_v62 }
0x1ac5   :  { %vm1481_vm5 = vmor %vm1479_vm3, %vm1480_vm2 }
0x1ac6   :  { %v1475_v52 = vmul.f32 %v1760_v62, %v1474_v40 }
0x1ac8   :  { %v1476_v4 = vmul.f32 0.5, %v1475_v52 }
0x1aca   :  { %v1477_v53 = vsub.f32 1.5, %v1476_v4 }
0x1acc   :  { %v1478_v41 = vmul.f32 %v1760_v62, %v1477_v53 }
0x1ace   :  { %v1482_v15 = vsel %vm1481_vm5, %v1760_v62, %v1478_v41 }
0x1acf   :  { %v1484_v26 = vmul.f32 %v1482_v15, %v1450_v43 }
0x1ad1   :  { %v1487_v55 = vmul.f32 %v1673_v17, %v1484_v26 }
0x1ad3   :  { %v1490_v56 = vadd.f32 %v1674_v23, %v1487_v55 }
0x1ad5   :  { %vm1492_vm6 = vcmp.ge.f32.partialorder %v1490_v56, 0.0  ;;  %v1494_v54 = vmul.f32 0.01, %v1490_v56 }
0x1ad7   :  { %v1496_v57 = vsel %vm1492_vm6, %v1490_v56, %v1494_v54 }
0x1ad8   :  { %1621 = vmatmul.msk.f32.gmra.mxu3 %vm43_vm0, %v1496_v57  ;;  %1623 = vmatmul.msk.f32.gmra.mxu0 %vm43_vm0, %v1496_v57 }
0x1b55   :  { %v1561_v22 = vpop.f32.mrf.mxu0 }
0x1b56   :  { %v1562_v60 = vadd.f32 %v1561_v22, %v1509_v31 }
0x1b58   :  { %1567 = vst [vmem:[#allocation2 + $0x18] sm:$0xff] %v1562_v60 }
0x1b5b   :  { %v1538_v61 = vpop.f32.mrf.mxu3 }
0x1b5c   :  { %v1539_v39 = vadd.f32 %v1538_v61, %v1508_v44 }
0x1b5e   :  { %1566 = vst [vmem:[#allocation2 + $0x10] sm:$0xff] %v1539_v39 }
0x1b5f   :  { %1580 = dma.vmem_to_hbm [thread:$0]  %s1573_s4, 512, %s1575_s1, [#allocation3], %s1794_s30, %s1794_s30, %s1795_s18  }
0x1b60   :  { %1785 = dma.done.wait [#allocation3], 512  }
0x1b61   :  { %1786 = vsyncadd [#allocation3], 4294966784 }
0x1b62   :  { %1585 = vsyncpa [#allocation3], 1 }

</bundles_post_ra>
